<compile_context>
chip_gen: v5e
topology: v5e:2x2
jax: 0.10.0
libtpu: 0.0.40
codegen_flags: <defaults>
</compile_context>

<pallas_src>
import math
from functools import partial

import numpy as np
import jax
import jax.numpy as jnp
from jax.experimental import pallas as pl
from jax.experimental.pallas import tpu as pltpu


# ------------------------------- kernel helpers -------------------------------

def _erf_f32(x):
    # Abramowitz & Stegun 7.1.26 rational approximation, |abs err| <= 1.5e-7
    # (float32-accurate stand-in for lax.erf, used for the exact / non-tanh GELU).
    a1, a2, a3, a4, a5 = 0.254829592, -0.284496736, 1.421413741, -1.453152027, 1.061405429
    p = 0.3275911
    sign = jnp.where(x >= 0.0, 1.0, -1.0)
    z = jnp.abs(x)
    t = 1.0 / (1.0 + p * z)
    poly = ((((a5 * t + a4) * t + a3) * t + a2) * t + a1) * t
    return sign * (1.0 - poly * jnp.exp(-z * z))


# --------------------------------- the kernel ---------------------------------

def self_block_kernel(x_ref, cos_ref, sin_ref,
                      wq_ref, wqr_ref, wk_ref, wkr_ref, wv_ref,
                      bq_ref, bqr_ref, bk_ref, bkr_ref, bv_ref,
                      wo_ref, bo_ref,
                      w1x_ref, w1m_ref, b1_ref, g_ref, beta_ref,
                      w2_ref, b2_ref,
                      o_ref, *, batch, seq, num_heads, head_dim):
    f32 = jnp.float32
    bf16 = jnp.bfloat16

    x = x_ref[...]                       # (B*N, E), float32 (kept f32 for the residual)
    xb = x.astype(bf16)                  # bf16 copy reused by every projection matmul
    cos = cos_ref[...]                   # (B*N, E)
    sin = sin_ref[...]                   # (B*N, E)

    def proj(w_ref, b_ref):
        return jnp.dot(xb, w_ref[...], preferred_element_type=f32) + b_ref[...]

    # Rotary is pre-folded into (WqR, bqR)/(WkR, bkR) => no lane permutation in-kernel.
    q = proj(wq_ref, bq_ref) * cos + proj(wqr_ref, bqr_ref) * sin
    k = proj(wk_ref, bk_ref) * cos + proj(wkr_ref, bkr_ref) * sin
    v = proj(wv_ref, bv_ref)

    scale = 1.0 / math.sqrt(head_dim)
    wo = wo_ref[...]                     # (E, E) bf16

    # Per-batch, per-head attention with out_proj fused into the head loop.
    msg_rows = []
    for b in range(batch):
        rsl = slice(b * seq, (b + 1) * seq)
        msg_b = None
        for h in range(num_heads):
            hsl = slice(h * head_dim, (h + 1) * head_dim)
            qh = q[rsl, hsl].astype(bf16)                      # (N, D)
            kh = k[rsl, hsl].astype(bf16)                      # (N, D)
            vh = v[rsl, hsl].astype(bf16)                      # (N, D)
            s = jax.lax.dot_general(qh, kh, (((1,), (1,)), ((), ())),
                                    preferred_element_type=f32) * scale   # (N, N)
            p = jnp.exp(s - jnp.max(s, axis=-1, keepdims=True))
            denom = jnp.sum(p, axis=-1, keepdims=True)
            ctx = jnp.dot(p.astype(bf16), vh, preferred_element_type=f32)  # (N, D)
            ctx = ctx * pl.reciprocal(denom, approx=True)                  # deferred softmax norm
            term = jnp.dot(ctx.astype(bf16), wo[hsl, :],
                           preferred_element_type=f32)                     # (N, E)
            msg_b = term if msg_b is None else msg_b + term
        msg_rows.append(msg_b)
    message = jnp.concatenate(msg_rows, axis=0) + bo_ref[...]              # (B*N, E)

    # FFN: Linear(2E->2E) -> LayerNorm -> GELU(exact) -> Linear(2E->E), residual add.
    # The [x, message] concat is replaced by a split weight (W1x, W1m).
    h1 = (jnp.dot(xb, w1x_ref[...], preferred_element_type=f32)
          + jnp.dot(message.astype(bf16), w1m_ref[...], preferred_element_type=f32)
          + b1_ref[...])                                                    # (B*N, 2E)
    mu = jnp.mean(h1, axis=-1, keepdims=True)
    var = jnp.mean(jnp.square(h1 - mu), axis=-1, keepdims=True)
    hn = (h1 - mu) * jax.lax.rsqrt(var + 1e-5) * g_ref[...] + beta_ref[...]
    gelu = 0.5 * hn * (1.0 + _erf_f32(hn * (1.0 / math.sqrt(2.0))))         # exact GELU

    o_ref[...] = x + jnp.dot(gelu.astype(bf16), w2_ref[...],
                             preferred_element_type=f32) + b2_ref[...]


# --------------------------------- the wrapper ---------------------------------

def self_block(x, encoding, params, num_heads):
    B, N, E = x.shape
    H = num_heads
    D = E // H
    f32, bf16 = jnp.float32, jnp.bfloat16

    # Re-pack the fused Wqkv (PyTorch output layout is interleaved (head, dim, {q,k,v}))
    # into separate head-major (in, out) projection matrices for the kernel.
    Wqkv = params["Wqkv_w"].reshape(H, D, 3, E)       # [h, d, s, in]
    bqkv = params["Wqkv_b"].reshape(H, D, 3)
    Wq = Wqkv[:, :, 0, :].reshape(E, E).T             # (in, out = h*D + d)
    Wk = Wqkv[:, :, 1, :].reshape(E, E).T
    Wv = Wqkv[:, :, 2, :].reshape(E, E).T
    bq = bqkv[:, :, 0].reshape(1, E)
    bk = bqkv[:, :, 1].reshape(1, E)
    bv = bqkv[:, :, 2].reshape(1, E)

    # rotate_half is a signed permutation of the projected features:
    #   rotate_half(t)[2i] = -t[2i+1],  rotate_half(t)[2i+1] = t[2i]
    # Fold it into extra projection matrices: (x@W + b)@R = x@(W@R) + b@R, where
    # column j of (W@R) is sign[j] * column src[j] of W (exact, pure re-indexing).
    j = np.arange(E)
    src = np.where(j % 2 == 0, j + 1, j - 1)
    sgn = jnp.asarray(np.where(j % 2 == 0, -1.0, 1.0), f32)[None, :]
    WqR, bqR = Wq[:, src] * sgn, bq[:, src] * sgn
    WkR, bkR = Wk[:, src] * sgn, bk[:, src] * sgn

    Wo = params["out_w"].T                            # (E, E)
    bo = params["out_b"].reshape(1, E)
    W1 = params["ffn1_w"].T                           # (2E, 2E)
    W1x, W1m = W1[:E, :], W1[E:, :]                   # split: h1 = x@W1x + msg@W1m + b1
    b1 = params["ffn1_b"].reshape(1, 2 * E)
    g = params["ln_g"].reshape(1, 2 * E)
    beta = params["ln_b"].reshape(1, 2 * E)
    W2 = params["ffn2_w"].T                           # (2E, E)
    b2 = params["ffn2_b"].reshape(1, E)

    # encoding: (2, B, 1, N, D) -> broadcast over heads (head-major) -> fold batch into rows.
    cos = jnp.tile(encoding[0][:, 0], (1, 1, H)).reshape(B * N, E).astype(f32)
    sin = jnp.tile(encoding[1][:, 0], (1, 1, H)).reshape(B * N, E).astype(f32)

    x2d = x.reshape(B * N, E).astype(f32)

    def full(shape):
        return pl.BlockSpec(shape, lambda i, _s=shape: (0,) * len(_s))

    kernel = partial(self_block_kernel, batch=B, seq=N, num_heads=H, head_dim=D)
    out2d = pl.pallas_call(
        kernel,
        out_shape=jax.ShapeDtypeStruct((B * N, E), f32),
        grid_spec=pltpu.PrefetchScalarGridSpec(
            num_scalar_prefetch=0,
            grid=(1,),   # single step: batch is folded into rows; weights fetched once
            in_specs=[full((B * N, E)), full((B * N, E)), full((B * N, E)),
                      full((E, E)), full((E, E)), full((E, E)), full((E, E)), full((E, E)),
                      full((1, E)), full((1, E)), full((1, E)), full((1, E)), full((1, E)),
                      full((E, E)), full((1, E)),
                      full((E, 2 * E)), full((E, 2 * E)),
                      full((1, 2 * E)), full((1, 2 * E)), full((1, 2 * E)),
                      full((2 * E, E)), full((1, E))],
            out_specs=full((B * N, E)),
        ),
        compiler_params=pltpu.CompilerParams(dimension_semantics=("arbitrary",)),
    )(x2d, cos, sin,
      Wq.astype(bf16), WqR.astype(bf16), Wk.astype(bf16), WkR.astype(bf16), Wv.astype(bf16),
      bq, bqR, bk, bkR, bv,
      Wo.astype(bf16), bo,
      W1x.astype(bf16), W1m.astype(bf16), b1, g, beta,
      W2.astype(bf16), b2)

    return out2d.reshape(B, N, E)


# ------------------------- deterministic parameter init -------------------------

def make_params(key, embed_dim):
    E = embed_dim
    ks = jax.random.split(key, 4)

    def linear(k, fan_in, fan_out):
        kw, kb = jax.random.split(k)
        bound = 1.0 / math.sqrt(fan_in)
        w = jax.random.uniform(kw, (fan_out, fan_in), jnp.float32, -bound, bound)
        b = jax.random.uniform(kb, (fan_out,), jnp.float32, -bound, bound)
        return w, b

    p = {}
    p["Wqkv_w"], p["Wqkv_b"] = linear(ks[0], E, 3 * E)          # nn.Linear(E, 3E)
    p["out_w"], p["out_b"] = linear(ks[1], E, E)                # nn.Linear(E, E)
    p["ffn1_w"], p["ffn1_b"] = linear(ks[2], 2 * E, 2 * E)      # nn.Linear(2E, 2E)
    p["ln_g"] = jnp.ones((2 * E,), jnp.float32)                 # LayerNorm affine
    p["ln_b"] = jnp.zeros((2 * E,), jnp.float32)
    p["ffn2_w"], p["ffn2_b"] = linear(ks[3], 2 * E, E)          # nn.Linear(2E, E)
    return p


# ------------------------------ pure-JAX reference ------------------------------

def self_block_reference(x, encoding, params, num_heads):
    B, N, E = x.shape
    H = num_heads
    D = E // H
    qkv = x @ params["Wqkv_w"].T + params["Wqkv_b"]
    qkv = qkv.reshape(B, N, H, D, 3).transpose(0, 2, 1, 3, 4)   # (B, H, N, D, 3)
    q, k, v = qkv[..., 0], qkv[..., 1], qkv[..., 2]

    def rotate_half(t):
        tr = t.reshape(t.shape[:-1] + (-1, 2))
        x1, x2 = tr[..., 0], tr[..., 1]
        return jnp.stack([-x2, x1], axis=-1).reshape(t.shape)

    q = q * encoding[0] + rotate_half(q) * encoding[1]
    k = k * encoding[0] + rotate_half(k) * encoding[1]

    s = jnp.einsum("bhid,bhjd->bhij", q, k) * (D ** -0.5)
    attn = jax.nn.softmax(s, axis=-1)
    ctx = jnp.einsum("bhij,bhjd->bhid", attn, v)
    ctx = ctx.transpose(0, 2, 1, 3).reshape(B, N, E)
    message = ctx @ params["out_w"].T + params["out_b"]

    h = jnp.concatenate([x, message], axis=-1) @ params["ffn1_w"].T + params["ffn1_b"]
    mu = h.mean(-1, keepdims=True)
    var = ((h - mu) ** 2).mean(-1, keepdims=True)
    hn = (h - mu) / jnp.sqrt(var + 1e-5) * params["ln_g"] + params["ln_b"]
    gelu = jax.nn.gelu(hn, approximate=False)
    return x + gelu @ params["ffn2_w"].T + params["ffn2_b"]


# ------------------------------------ main ------------------------------------

if __name__ == "__main__":
    B, N, E, H = 2, 16, 64, 2
    D = E // H

    key = jax.random.PRNGKey(0)
    k_x, k_p = jax.random.split(key)
    x = jax.random.normal(k_x, (B, N, E), jnp.float32)
    params = make_params(k_p, E)

    # Rotary positional encoding in the LightGlue layout: (2, B, 1, N, head_dim).
    pos = jnp.arange(N, dtype=jnp.float32)
    inv_freq = 1.0 / (10000.0 ** (jnp.arange(0, D, 2, dtype=jnp.float32) / D))
    ang = jnp.repeat(pos[:, None] * inv_freq[None, :], 2, axis=-1)       # (N, D)
    cos = jnp.broadcast_to(jnp.cos(ang), (B, 1, N, D))
    sin = jnp.broadcast_to(jnp.sin(ang), (B, 1, N, D))
    encoding = jnp.stack([cos, sin], axis=0)                             # (2, B, 1, N, D)

    out = jax.jit(partial(self_block, num_heads=H))(x, encoding, params)
    out = jax.block_until_ready(out)

    with jax.default_matmul_precision("float32"):
        ref = jax.block_until_ready(self_block_reference(x, encoding, params, H))

    assert out.shape == (B, N, E) and out.dtype == jnp.float32
    max_err = float(jnp.max(jnp.abs(out - ref)))
    # Tolerance covers the bf16 matmul operands + approximate reciprocal in the kernel.
    assert jnp.allclose(out, ref, atol=5e-2, rtol=5e-2), f"max abs err = {max_err}"
    print("KERNEL_OK")
</pallas_src>

<mosaic_0001>
module attributes {stable_mosaic.version = 11 : i64} {
  func.func @self_block_kernel(%arg0: i32, %arg1: memref<32x64xf32, #tpu.memory_space<vmem>>, %arg2: memref<32x64xf32, #tpu.memory_space<vmem>>, %arg3: memref<32x64xf32, #tpu.memory_space<vmem>>, %arg4: memref<64x64xbf16, #tpu.memory_space<vmem>>, %arg5: memref<64x64xbf16, #tpu.memory_space<vmem>>, %arg6: memref<64x64xbf16, #tpu.memory_space<vmem>>, %arg7: memref<64x64xbf16, #tpu.memory_space<vmem>>, %arg8: memref<64x64xbf16, #tpu.memory_space<vmem>>, %arg9: memref<1x64xf32, #tpu.memory_space<vmem>>, %arg10: memref<1x64xf32, #tpu.memory_space<vmem>>, %arg11: memref<1x64xf32, #tpu.memory_space<vmem>>, %arg12: memref<1x64xf32, #tpu.memory_space<vmem>>, %arg13: memref<1x64xf32, #tpu.memory_space<vmem>>, %arg14: memref<64x64xbf16, #tpu.memory_space<vmem>>, %arg15: memref<1x64xf32, #tpu.memory_space<vmem>>, %arg16: memref<64x128xbf16, #tpu.memory_space<vmem>>, %arg17: memref<64x128xbf16, #tpu.memory_space<vmem>>, %arg18: memref<1x128xf32, #tpu.memory_space<vmem>>, %arg19: memref<1x128xf32, #tpu.memory_space<vmem>>, %arg20: memref<1x128xf32, #tpu.memory_space<vmem>>, %arg21: memref<128x64xbf16, #tpu.memory_space<vmem>>, %arg22: memref<1x64xf32, #tpu.memory_space<vmem>>, %arg23: memref<32x64xf32, #tpu.memory_space<vmem>>) attributes {dimension_semantics = [#tpu.dimension_semantics<arbitrary>], iteration_bounds = array<i64: 1>, scalar_prefetch = 0 : i64, scratch_operands = 0 : i64, tpu.core_type = #tpu.core_type<tc>, window_params = [{pipeline_mode = #tpu.pipeline_mode<synchronous>, transform_indices = @transform_0, window_bounds = array<i64: 32, 64>}, {pipeline_mode = #tpu.pipeline_mode<synchronous>, transform_indices = @transform_1, window_bounds = array<i64: 32, 64>}, {pipeline_mode = #tpu.pipeline_mode<synchronous>, transform_indices = @transform_2, window_bounds = array<i64: 32, 64>}, {pipeline_mode = #tpu.pipeline_mode<synchronous>, transform_indices = @transform_3, window_bounds = array<i64: 64, 64>}, {pipeline_mode = #tpu.pipeline_mode<synchronous>, transform_indices = @transform_4, window_bounds = array<i64: 64, 64>}, {pipeline_mode = #tpu.pipeline_mode<synchronous>, transform_indices = @transform_5, window_bounds = array<i64: 64, 64>}, {pipeline_mode = #tpu.pipeline_mode<synchronous>, transform_indices = @transform_6, window_bounds = array<i64: 64, 64>}, {pipeline_mode = #tpu.pipeline_mode<synchronous>, transform_indices = @transform_7, window_bounds = array<i64: 64, 64>}, {pipeline_mode = #tpu.pipeline_mode<synchronous>, transform_indices = @transform_8, window_bounds = array<i64: 1, 64>}, {pipeline_mode = #tpu.pipeline_mode<synchronous>, transform_indices = @transform_9, window_bounds = array<i64: 1, 64>}, {pipeline_mode = #tpu.pipeline_mode<synchronous>, transform_indices = @transform_10, window_bounds = array<i64: 1, 64>}, {pipeline_mode = #tpu.pipeline_mode<synchronous>, transform_indices = @transform_11, window_bounds = array<i64: 1, 64>}, {pipeline_mode = #tpu.pipeline_mode<synchronous>, transform_indices = @transform_12, window_bounds = array<i64: 1, 64>}, {pipeline_mode = #tpu.pipeline_mode<synchronous>, transform_indices = @transform_13, window_bounds = array<i64: 64, 64>}, {pipeline_mode = #tpu.pipeline_mode<synchronous>, transform_indices = @transform_14, window_bounds = array<i64: 1, 64>}, {pipeline_mode = #tpu.pipeline_mode<synchronous>, transform_indices = @transform_15, window_bounds = array<i64: 64, 128>}, {pipeline_mode = #tpu.pipeline_mode<synchronous>, transform_indices = @transform_16, window_bounds = array<i64: 64, 128>}, {pipeline_mode = #tpu.pipeline_mode<synchronous>, transform_indices = @transform_17, window_bounds = array<i64: 1, 128>}, {pipeline_mode = #tpu.pipeline_mode<synchronous>, transform_indices = @transform_18, window_bounds = array<i64: 1, 128>}, {pipeline_mode = #tpu.pipeline_mode<synchronous>, transform_indices = @transform_19, window_bounds = array<i64: 1, 128>}, {pipeline_mode = #tpu.pipeline_mode<synchronous>, transform_indices = @transform_20, window_bounds = array<i64: 128, 64>}, {pipeline_mode = #tpu.pipeline_mode<synchronous>, transform_indices = @transform_21, window_bounds = array<i64: 1, 64>}, {pipeline_mode = #tpu.pipeline_mode<synchronous>, transform_indices = @transform_22, window_bounds = array<i64: 32, 64>}]} {
    %c0 = arith.constant 0 : index
    %c0_0 = arith.constant 0 : index
    %0 = vector.load %arg1[%c0, %c0_0] : memref<32x64xf32, #tpu.memory_space<vmem>>, vector<32x64xf32>
    %1 = arith.truncf %0 : vector<32x64xf32> to vector<32x64xbf16>
    %c0_1 = arith.constant 0 : index
    %c0_2 = arith.constant 0 : index
    %2 = vector.load %arg2[%c0_1, %c0_2] : memref<32x64xf32, #tpu.memory_space<vmem>>, vector<32x64xf32>
    %c0_3 = arith.constant 0 : index
    %c0_4 = arith.constant 0 : index
    %3 = vector.load %arg3[%c0_3, %c0_4] : memref<32x64xf32, #tpu.memory_space<vmem>>, vector<32x64xf32>
    %c0_5 = arith.constant 0 : index
    %c0_6 = arith.constant 0 : index
    %4 = vector.load %arg4[%c0_5, %c0_6] : memref<64x64xbf16, #tpu.memory_space<vmem>>, vector<64x64xbf16>
    %cst = arith.constant dense<0.000000e+00> : vector<32x64xf32>
    %5 = tpu.matmul %1, %4, %cst {dimension_numbers = #tpu.dot_dimension_numbers<[1], [0], [0], [1], [0, 0, 1, 1], [], []>} : vector<32x64xbf16>, vector<64x64xbf16>, vector<32x64xf32> -> vector<32x64xf32>
    %c0_7 = arith.constant 0 : index
    %c0_8 = arith.constant 0 : index
    %6 = vector.load %arg9[%c0_7, %c0_8] : memref<1x64xf32, #tpu.memory_space<vmem>>, vector<1x64xf32>
    %7 = vector.broadcast %6 : vector<1x64xf32> to vector<32x64xf32>
    %8 = arith.addf %5, %7 : vector<32x64xf32>
    %9 = arith.mulf %8, %2 : vector<32x64xf32>
    %c0_9 = arith.constant 0 : index
    %c0_10 = arith.constant 0 : index
    %10 = vector.load %arg5[%c0_9, %c0_10] : memref<64x64xbf16, #tpu.memory_space<vmem>>, vector<64x64xbf16>
    %cst_11 = arith.constant dense<0.000000e+00> : vector<32x64xf32>
    %11 = tpu.matmul %1, %10, %cst_11 {dimension_numbers = #tpu.dot_dimension_numbers<[1], [0], [0], [1], [0, 0, 1, 1], [], []>} : vector<32x64xbf16>, vector<64x64xbf16>, vector<32x64xf32> -> vector<32x64xf32>
    %c0_12 = arith.constant 0 : index
    %c0_13 = arith.constant 0 : index
    %12 = vector.load %arg10[%c0_12, %c0_13] : memref<1x64xf32, #tpu.memory_space<vmem>>, vector<1x64xf32>
    %13 = vector.broadcast %12 : vector<1x64xf32> to vector<32x64xf32>
    %14 = arith.addf %11, %13 : vector<32x64xf32>
    %15 = arith.mulf %14, %3 : vector<32x64xf32>
    %16 = arith.addf %9, %15 : vector<32x64xf32>
    %c0_14 = arith.constant 0 : index
    %c0_15 = arith.constant 0 : index
    %17 = vector.load %arg6[%c0_14, %c0_15] : memref<64x64xbf16, #tpu.memory_space<vmem>>, vector<64x64xbf16>
    %cst_16 = arith.constant dense<0.000000e+00> : vector<32x64xf32>
    %18 = tpu.matmul %1, %17, %cst_16 {dimension_numbers = #tpu.dot_dimension_numbers<[1], [0], [0], [1], [0, 0, 1, 1], [], []>} : vector<32x64xbf16>, vector<64x64xbf16>, vector<32x64xf32> -> vector<32x64xf32>
    %c0_17 = arith.constant 0 : index
    %c0_18 = arith.constant 0 : index
    %19 = vector.load %arg11[%c0_17, %c0_18] : memref<1x64xf32, #tpu.memory_space<vmem>>, vector<1x64xf32>
    %20 = vector.broadcast %19 : vector<1x64xf32> to vector<32x64xf32>
    %21 = arith.addf %18, %20 : vector<32x64xf32>
    %22 = arith.mulf %21, %2 : vector<32x64xf32>
    %c0_19 = arith.constant 0 : index
    %c0_20 = arith.constant 0 : index
    %23 = vector.load %arg7[%c0_19, %c0_20] : memref<64x64xbf16, #tpu.memory_space<vmem>>, vector<64x64xbf16>
    %cst_21 = arith.constant dense<0.000000e+00> : vector<32x64xf32>
    %24 = tpu.matmul %1, %23, %cst_21 {dimension_numbers = #tpu.dot_dimension_numbers<[1], [0], [0], [1], [0, 0, 1, 1], [], []>} : vector<32x64xbf16>, vector<64x64xbf16>, vector<32x64xf32> -> vector<32x64xf32>
    %c0_22 = arith.constant 0 : index
    %c0_23 = arith.constant 0 : index
    %25 = vector.load %arg12[%c0_22, %c0_23] : memref<1x64xf32, #tpu.memory_space<vmem>>, vector<1x64xf32>
    %26 = vector.broadcast %25 : vector<1x64xf32> to vector<32x64xf32>
    %27 = arith.addf %24, %26 : vector<32x64xf32>
    %28 = arith.mulf %27, %3 : vector<32x64xf32>
    %29 = arith.addf %22, %28 : vector<32x64xf32>
    %c0_24 = arith.constant 0 : index
    %c0_25 = arith.constant 0 : index
    %30 = vector.load %arg8[%c0_24, %c0_25] : memref<64x64xbf16, #tpu.memory_space<vmem>>, vector<64x64xbf16>
    %cst_26 = arith.constant dense<0.000000e+00> : vector<32x64xf32>
    %31 = tpu.matmul %1, %30, %cst_26 {dimension_numbers = #tpu.dot_dimension_numbers<[1], [0], [0], [1], [0, 0, 1, 1], [], []>} : vector<32x64xbf16>, vector<64x64xbf16>, vector<32x64xf32> -> vector<32x64xf32>
    %c0_27 = arith.constant 0 : index
    %c0_28 = arith.constant 0 : index
    %32 = vector.load %arg13[%c0_27, %c0_28] : memref<1x64xf32, #tpu.memory_space<vmem>>, vector<1x64xf32>
    %33 = vector.broadcast %32 : vector<1x64xf32> to vector<32x64xf32>
    %34 = arith.addf %31, %33 : vector<32x64xf32>
    %c0_29 = arith.constant 0 : index
    %c0_30 = arith.constant 0 : index
    %35 = vector.load %arg14[%c0_29, %c0_30] : memref<64x64xbf16, #tpu.memory_space<vmem>>, vector<64x64xbf16>
    %36 = vector.extract_strided_slice %16 {offsets = [0, 0], sizes = [16, 32], strides = [1, 1]} : vector<32x64xf32> to vector<16x32xf32>
    %37 = arith.truncf %36 : vector<16x32xf32> to vector<16x32xbf16>
    %38 = vector.extract_strided_slice %29 {offsets = [0, 0], sizes = [16, 32], strides = [1, 1]} : vector<32x64xf32> to vector<16x32xf32>
    %39 = arith.truncf %38 : vector<16x32xf32> to vector<16x32xbf16>
    %40 = vector.extract_strided_slice %34 {offsets = [0, 0], sizes = [16, 32], strides = [1, 1]} : vector<32x64xf32> to vector<16x32xf32>
    %41 = arith.truncf %40 : vector<16x32xf32> to vector<16x32xbf16>
    %cst_31 = arith.constant dense<0.000000e+00> : vector<16x16xf32>
    %42 = tpu.matmul %37, %39, %cst_31 {dimension_numbers = #tpu.dot_dimension_numbers<[1], [1], [0], [0], [0, 0, 1, 0], [], []>} : vector<16x32xbf16>, vector<16x32xbf16>, vector<16x16xf32> -> vector<16x16xf32>
    %cst_32 = arith.constant 0.176776692 : f32
    %43 = vector.broadcast %cst_32 : f32 to vector<16x16xf32>
    %44 = arith.mulf %42, %43 : vector<16x16xf32>
    %cst_33 = arith.constant dense<0xFF800000> : vector<16xf32>
    %45 = vector.multi_reduction <maximumf>, %44, %cst_33 [1] : vector<16x16xf32> to vector<16xf32>
    %46 = vector.shape_cast %45 : vector<16xf32> to vector<16x1xf32>
    %47 = vector.broadcast %46 : vector<16x1xf32> to vector<16x16xf32>
    %48 = arith.subf %44, %47 : vector<16x16xf32>
    %49 = math.exp %48 : vector<16x16xf32>
    %cst_34 = arith.constant dense<0.000000e+00> : vector<16xf32>
    %50 = vector.multi_reduction <add>, %49, %cst_34 [1] : vector<16x16xf32> to vector<16xf32>
    %51 = vector.shape_cast %50 : vector<16xf32> to vector<16x1xf32>
    %52 = arith.truncf %49 : vector<16x16xf32> to vector<16x16xbf16>
    %cst_35 = arith.constant dense<0.000000e+00> : vector<16x32xf32>
    %53 = tpu.matmul %52, %41, %cst_35 {dimension_numbers = #tpu.dot_dimension_numbers<[1], [0], [0], [1], [0, 0, 1, 1], [], []>} : vector<16x16xbf16>, vector<16x32xbf16>, vector<16x32xf32> -> vector<16x32xf32>
    %54 = tpu.reciprocal %51 {approx = true} : vector<16x1xf32> -> vector<16x1xf32>
    %55 = vector.broadcast %54 : vector<16x1xf32> to vector<16x32xf32>
    %56 = arith.mulf %53, %55 : vector<16x32xf32>
    %57 = arith.truncf %56 : vector<16x32xf32> to vector<16x32xbf16>
    %58 = vector.extract_strided_slice %35 {offsets = [0, 0], sizes = [32, 64], strides = [1, 1]} : vector<64x64xbf16> to vector<32x64xbf16>
    %cst_36 = arith.constant dense<0.000000e+00> : vector<16x64xf32>
    %59 = tpu.matmul %57, %58, %cst_36 {dimension_numbers = #tpu.dot_dimension_numbers<[1], [0], [0], [1], [0, 0, 1, 1], [], []>} : vector<16x32xbf16>, vector<32x64xbf16>, vector<16x64xf32> -> vector<16x64xf32>
    %60 = vector.extract_strided_slice %16 {offsets = [0, 32], sizes = [16, 32], strides = [1, 1]} : vector<32x64xf32> to vector<16x32xf32>
    %61 = arith.truncf %60 : vector<16x32xf32> to vector<16x32xbf16>
    %62 = vector.extract_strided_slice %29 {offsets = [0, 32], sizes = [16, 32], strides = [1, 1]} : vector<32x64xf32> to vector<16x32xf32>
    %63 = arith.truncf %62 : vector<16x32xf32> to vector<16x32xbf16>
    %64 = vector.extract_strided_slice %34 {offsets = [0, 32], sizes = [16, 32], strides = [1, 1]} : vector<32x64xf32> to vector<16x32xf32>
    %65 = arith.truncf %64 : vector<16x32xf32> to vector<16x32xbf16>
    %cst_37 = arith.constant dense<0.000000e+00> : vector<16x16xf32>
    %66 = tpu.matmul %61, %63, %cst_37 {dimension_numbers = #tpu.dot_dimension_numbers<[1], [1], [0], [0], [0, 0, 1, 0], [], []>} : vector<16x32xbf16>, vector<16x32xbf16>, vector<16x16xf32> -> vector<16x16xf32>
    %cst_38 = arith.constant 0.176776692 : f32
    %67 = vector.broadcast %cst_38 : f32 to vector<16x16xf32>
    %68 = arith.mulf %66, %67 : vector<16x16xf32>
    %cst_39 = arith.constant dense<0xFF800000> : vector<16xf32>
    %69 = vector.multi_reduction <maximumf>, %68, %cst_39 [1] : vector<16x16xf32> to vector<16xf32>
    %70 = vector.shape_cast %69 : vector<16xf32> to vector<16x1xf32>
    %71 = vector.broadcast %70 : vector<16x1xf32> to vector<16x16xf32>
    %72 = arith.subf %68, %71 : vector<16x16xf32>
    %73 = math.exp %72 : vector<16x16xf32>
    %cst_40 = arith.constant dense<0.000000e+00> : vector<16xf32>
    %74 = vector.multi_reduction <add>, %73, %cst_40 [1] : vector<16x16xf32> to vector<16xf32>
    %75 = vector.shape_cast %74 : vector<16xf32> to vector<16x1xf32>
    %76 = arith.truncf %73 : vector<16x16xf32> to vector<16x16xbf16>
    %cst_41 = arith.constant dense<0.000000e+00> : vector<16x32xf32>
    %77 = tpu.matmul %76, %65, %cst_41 {dimension_numbers = #tpu.dot_dimension_numbers<[1], [0], [0], [1], [0, 0, 1, 1], [], []>} : vector<16x16xbf16>, vector<16x32xbf16>, vector<16x32xf32> -> vector<16x32xf32>
    %78 = tpu.reciprocal %75 {approx = true} : vector<16x1xf32> -> vector<16x1xf32>
    %79 = vector.broadcast %78 : vector<16x1xf32> to vector<16x32xf32>
    %80 = arith.mulf %77, %79 : vector<16x32xf32>
    %81 = arith.truncf %80 : vector<16x32xf32> to vector<16x32xbf16>
    %82 = vector.extract_strided_slice %35 {offsets = [32, 0], sizes = [32, 64], strides = [1, 1]} : vector<64x64xbf16> to vector<32x64xbf16>
    %cst_42 = arith.constant dense<0.000000e+00> : vector<16x64xf32>
    %83 = tpu.matmul %81, %82, %cst_42 {dimension_numbers = #tpu.dot_dimension_numbers<[1], [0], [0], [1], [0, 0, 1, 1], [], []>} : vector<16x32xbf16>, vector<32x64xbf16>, vector<16x64xf32> -> vector<16x64xf32>
    %84 = arith.addf %59, %83 : vector<16x64xf32>
    %85 = vector.extract_strided_slice %16 {offsets = [16, 0], sizes = [16, 32], strides = [1, 1]} : vector<32x64xf32> to vector<16x32xf32>
    %86 = arith.truncf %85 : vector<16x32xf32> to vector<16x32xbf16>
    %87 = vector.extract_strided_slice %29 {offsets = [16, 0], sizes = [16, 32], strides = [1, 1]} : vector<32x64xf32> to vector<16x32xf32>
    %88 = arith.truncf %87 : vector<16x32xf32> to vector<16x32xbf16>
    %89 = vector.extract_strided_slice %34 {offsets = [16, 0], sizes = [16, 32], strides = [1, 1]} : vector<32x64xf32> to vector<16x32xf32>
    %90 = arith.truncf %89 : vector<16x32xf32> to vector<16x32xbf16>
    %cst_43 = arith.constant dense<0.000000e+00> : vector<16x16xf32>
    %91 = tpu.matmul %86, %88, %cst_43 {dimension_numbers = #tpu.dot_dimension_numbers<[1], [1], [0], [0], [0, 0, 1, 0], [], []>} : vector<16x32xbf16>, vector<16x32xbf16>, vector<16x16xf32> -> vector<16x16xf32>
    %cst_44 = arith.constant 0.176776692 : f32
    %92 = vector.broadcast %cst_44 : f32 to vector<16x16xf32>
    %93 = arith.mulf %91, %92 : vector<16x16xf32>
    %cst_45 = arith.constant dense<0xFF800000> : vector<16xf32>
    %94 = vector.multi_reduction <maximumf>, %93, %cst_45 [1] : vector<16x16xf32> to vector<16xf32>
    %95 = vector.shape_cast %94 : vector<16xf32> to vector<16x1xf32>
    %96 = vector.broadcast %95 : vector<16x1xf32> to vector<16x16xf32>
    %97 = arith.subf %93, %96 : vector<16x16xf32>
    %98 = math.exp %97 : vector<16x16xf32>
    %cst_46 = arith.constant dense<0.000000e+00> : vector<16xf32>
    %99 = vector.multi_reduction <add>, %98, %cst_46 [1] : vector<16x16xf32> to vector<16xf32>
    %100 = vector.shape_cast %99 : vector<16xf32> to vector<16x1xf32>
    %101 = arith.truncf %98 : vector<16x16xf32> to vector<16x16xbf16>
    %cst_47 = arith.constant dense<0.000000e+00> : vector<16x32xf32>
    %102 = tpu.matmul %101, %90, %cst_47 {dimension_numbers = #tpu.dot_dimension_numbers<[1], [0], [0], [1], [0, 0, 1, 1], [], []>} : vector<16x16xbf16>, vector<16x32xbf16>, vector<16x32xf32> -> vector<16x32xf32>
    %103 = tpu.reciprocal %100 {approx = true} : vector<16x1xf32> -> vector<16x1xf32>
    %104 = vector.broadcast %103 : vector<16x1xf32> to vector<16x32xf32>
    %105 = arith.mulf %102, %104 : vector<16x32xf32>
    %106 = arith.truncf %105 : vector<16x32xf32> to vector<16x32xbf16>
    %107 = vector.extract_strided_slice %35 {offsets = [0, 0], sizes = [32, 64], strides = [1, 1]} : vector<64x64xbf16> to vector<32x64xbf16>
    %cst_48 = arith.constant dense<0.000000e+00> : vector<16x64xf32>
    %108 = tpu.matmul %106, %107, %cst_48 {dimension_numbers = #tpu.dot_dimension_numbers<[1], [0], [0], [1], [0, 0, 1, 1], [], []>} : vector<16x32xbf16>, vector<32x64xbf16>, vector<16x64xf32> -> vector<16x64xf32>
    %109 = vector.extract_strided_slice %16 {offsets = [16, 32], sizes = [16, 32], strides = [1, 1]} : vector<32x64xf32> to vector<16x32xf32>
    %110 = arith.truncf %109 : vector<16x32xf32> to vector<16x32xbf16>
    %111 = vector.extract_strided_slice %29 {offsets = [16, 32], sizes = [16, 32], strides = [1, 1]} : vector<32x64xf32> to vector<16x32xf32>
    %112 = arith.truncf %111 : vector<16x32xf32> to vector<16x32xbf16>
    %113 = vector.extract_strided_slice %34 {offsets = [16, 32], sizes = [16, 32], strides = [1, 1]} : vector<32x64xf32> to vector<16x32xf32>
    %114 = arith.truncf %113 : vector<16x32xf32> to vector<16x32xbf16>
    %cst_49 = arith.constant dense<0.000000e+00> : vector<16x16xf32>
    %115 = tpu.matmul %110, %112, %cst_49 {dimension_numbers = #tpu.dot_dimension_numbers<[1], [1], [0], [0], [0, 0, 1, 0], [], []>} : vector<16x32xbf16>, vector<16x32xbf16>, vector<16x16xf32> -> vector<16x16xf32>
    %cst_50 = arith.constant 0.176776692 : f32
    %116 = vector.broadcast %cst_50 : f32 to vector<16x16xf32>
    %117 = arith.mulf %115, %116 : vector<16x16xf32>
    %cst_51 = arith.constant dense<0xFF800000> : vector<16xf32>
    %118 = vector.multi_reduction <maximumf>, %117, %cst_51 [1] : vector<16x16xf32> to vector<16xf32>
    %119 = vector.shape_cast %118 : vector<16xf32> to vector<16x1xf32>
    %120 = vector.broadcast %119 : vector<16x1xf32> to vector<16x16xf32>
    %121 = arith.subf %117, %120 : vector<16x16xf32>
    %122 = math.exp %121 : vector<16x16xf32>
    %cst_52 = arith.constant dense<0.000000e+00> : vector<16xf32>
    %123 = vector.multi_reduction <add>, %122, %cst_52 [1] : vector<16x16xf32> to vector<16xf32>
    %124 = vector.shape_cast %123 : vector<16xf32> to vector<16x1xf32>
    %125 = arith.truncf %122 : vector<16x16xf32> to vector<16x16xbf16>
    %cst_53 = arith.constant dense<0.000000e+00> : vector<16x32xf32>
    %126 = tpu.matmul %125, %114, %cst_53 {dimension_numbers = #tpu.dot_dimension_numbers<[1], [0], [0], [1], [0, 0, 1, 1], [], []>} : vector<16x16xbf16>, vector<16x32xbf16>, vector<16x32xf32> -> vector<16x32xf32>
    %127 = tpu.reciprocal %124 {approx = true} : vector<16x1xf32> -> vector<16x1xf32>
    %128 = vector.broadcast %127 : vector<16x1xf32> to vector<16x32xf32>
    %129 = arith.mulf %126, %128 : vector<16x32xf32>
    %130 = arith.truncf %129 : vector<16x32xf32> to vector<16x32xbf16>
    %131 = vector.extract_strided_slice %35 {offsets = [32, 0], sizes = [32, 64], strides = [1, 1]} : vector<64x64xbf16> to vector<32x64xbf16>
    %cst_54 = arith.constant dense<0.000000e+00> : vector<16x64xf32>
    %132 = tpu.matmul %130, %131, %cst_54 {dimension_numbers = #tpu.dot_dimension_numbers<[1], [0], [0], [1], [0, 0, 1, 1], [], []>} : vector<16x32xbf16>, vector<32x64xbf16>, vector<16x64xf32> -> vector<16x64xf32>
    %133 = arith.addf %108, %132 : vector<16x64xf32>
    %134 = tpu.concatenate %84, %133 in 0 : vector<16x64xf32>, vector<16x64xf32> -> vector<32x64xf32>
    %c0_55 = arith.constant 0 : index
    %c0_56 = arith.constant 0 : index
    %135 = vector.load %arg15[%c0_55, %c0_56] : memref<1x64xf32, #tpu.memory_space<vmem>>, vector<1x64xf32>
    %136 = vector.broadcast %135 : vector<1x64xf32> to vector<32x64xf32>
    %137 = arith.addf %134, %136 : vector<32x64xf32>
    %c0_57 = arith.constant 0 : index
    %c0_58 = arith.constant 0 : index
    %138 = vector.load %arg16[%c0_57, %c0_58] : memref<64x128xbf16, #tpu.memory_space<vmem>>, vector<64x128xbf16>
    %cst_59 = arith.constant dense<0.000000e+00> : vector<32x128xf32>
    %139 = tpu.matmul %1, %138, %cst_59 {dimension_numbers = #tpu.dot_dimension_numbers<[1], [0], [0], [1], [0, 0, 1, 1], [], []>} : vector<32x64xbf16>, vector<64x128xbf16>, vector<32x128xf32> -> vector<32x128xf32>
    %140 = arith.truncf %137 : vector<32x64xf32> to vector<32x64xbf16>
    %c0_60 = arith.constant 0 : index
    %c0_61 = arith.constant 0 : index
    %141 = vector.load %arg17[%c0_60, %c0_61] : memref<64x128xbf16, #tpu.memory_space<vmem>>, vector<64x128xbf16>
    %cst_62 = arith.constant dense<0.000000e+00> : vector<32x128xf32>
    %142 = tpu.matmul %140, %141, %cst_62 {dimension_numbers = #tpu.dot_dimension_numbers<[1], [0], [0], [1], [0, 0, 1, 1], [], []>} : vector<32x64xbf16>, vector<64x128xbf16>, vector<32x128xf32> -> vector<32x128xf32>
    %143 = arith.addf %139, %142 : vector<32x128xf32>
    %c0_63 = arith.constant 0 : index
    %c0_64 = arith.constant 0 : index
    %144 = vector.load %arg18[%c0_63, %c0_64] : memref<1x128xf32, #tpu.memory_space<vmem>>, vector<1x128xf32>
    %145 = vector.broadcast %144 : vector<1x128xf32> to vector<32x128xf32>
    %146 = arith.addf %143, %145 : vector<32x128xf32>
    %cst_65 = arith.constant dense<0.000000e+00> : vector<32xf32>
    %147 = vector.multi_reduction <add>, %146, %cst_65 [1] : vector<32x128xf32> to vector<32xf32>
    %148 = vector.shape_cast %147 : vector<32xf32> to vector<32x1xf32>
    %cst_66 = arith.constant 1.280000e+02 : f32
    %149 = vector.broadcast %cst_66 : f32 to vector<32x1xf32>
    %150 = arith.divf %148, %149 : vector<32x1xf32>
    %151 = vector.broadcast %150 : vector<32x1xf32> to vector<32x128xf32>
    %152 = arith.subf %146, %151 : vector<32x128xf32>
    %153 = arith.mulf %152, %152 : vector<32x128xf32>
    %cst_67 = arith.constant dense<0.000000e+00> : vector<32xf32>
    %154 = vector.multi_reduction <add>, %153, %cst_67 [1] : vector<32x128xf32> to vector<32xf32>
    %155 = vector.shape_cast %154 : vector<32xf32> to vector<32x1xf32>
    %cst_68 = arith.constant 1.280000e+02 : f32
    %156 = vector.broadcast %cst_68 : f32 to vector<32x1xf32>
    %157 = arith.divf %155, %156 : vector<32x1xf32>
    %158 = vector.broadcast %150 : vector<32x1xf32> to vector<32x128xf32>
    %159 = arith.subf %146, %158 : vector<32x128xf32>
    %cst_69 = arith.constant 9.99999974E-6 : f32
    %160 = vector.broadcast %cst_69 : f32 to vector<32x1xf32>
    %161 = arith.addf %157, %160 : vector<32x1xf32>
    %162 = math.rsqrt %161 : vector<32x1xf32>
    %163 = vector.broadcast %162 : vector<32x1xf32> to vector<32x128xf32>
    %164 = arith.mulf %159, %163 : vector<32x128xf32>
    %c0_70 = arith.constant 0 : index
    %c0_71 = arith.constant 0 : index
    %165 = vector.load %arg19[%c0_70, %c0_71] : memref<1x128xf32, #tpu.memory_space<vmem>>, vector<1x128xf32>
    %166 = vector.broadcast %165 : vector<1x128xf32> to vector<32x128xf32>
    %167 = arith.mulf %164, %166 : vector<32x128xf32>
    %c0_72 = arith.constant 0 : index
    %c0_73 = arith.constant 0 : index
    %168 = vector.load %arg20[%c0_72, %c0_73] : memref<1x128xf32, #tpu.memory_space<vmem>>, vector<1x128xf32>
    %169 = vector.broadcast %168 : vector<1x128xf32> to vector<32x128xf32>
    %170 = arith.addf %167, %169 : vector<32x128xf32>
    %cst_74 = arith.constant 5.000000e-01 : f32
    %171 = vector.broadcast %cst_74 : f32 to vector<32x128xf32>
    %172 = arith.mulf %171, %170 : vector<32x128xf32>
    %cst_75 = arith.constant 0.707106769 : f32
    %173 = vector.broadcast %cst_75 : f32 to vector<32x128xf32>
    %174 = arith.mulf %170, %173 : vector<32x128xf32>
    %cst_76 = arith.constant 0.000000e+00 : f32
    %175 = vector.broadcast %cst_76 : f32 to vector<32x128xf32>
    %176 = arith.cmpf oge, %174, %175 : vector<32x128xf32>
    %cst_77 = arith.constant 1.000000e+00 : f32
    %cst_78 = arith.constant -1.000000e+00 : f32
    %177 = vector.broadcast %cst_77 : f32 to vector<32x128xf32>
    %178 = vector.broadcast %cst_78 : f32 to vector<32x128xf32>
    %179 = arith.select %176, %177, %178 : vector<32x128xi1>, vector<32x128xf32>
    %180 = math.absf %174 : vector<32x128xf32>
    %cst_79 = arith.constant 0.327591091 : f32
    %181 = vector.broadcast %cst_79 : f32 to vector<32x128xf32>
    %182 = arith.mulf %181, %180 : vector<32x128xf32>
    %cst_80 = arith.constant 1.000000e+00 : f32
    %183 = vector.broadcast %cst_80 : f32 to vector<32x128xf32>
    %184 = arith.addf %183, %182 : vector<32x128xf32>
    %cst_81 = arith.constant 1.000000e+00 : f32
    %185 = vector.broadcast %cst_81 : f32 to vector<32x128xf32>
    %186 = arith.divf %185, %184 : vector<32x128xf32>
    %cst_82 = arith.constant 1.06140542 : f32
    %187 = vector.broadcast %cst_82 : f32 to vector<32x128xf32>
    %188 = arith.mulf %187, %186 : vector<32x128xf32>
    %cst_83 = arith.constant -1.45315206 : f32
    %189 = vector.broadcast %cst_83 : f32 to vector<32x128xf32>
    %190 = arith.addf %188, %189 : vector<32x128xf32>
    %191 = arith.mulf %190, %186 : vector<32x128xf32>
    %cst_84 = arith.constant 1.42141378 : f32
    %192 = vector.broadcast %cst_84 : f32 to vector<32x128xf32>
    %193 = arith.addf %191, %192 : vector<32x128xf32>
    %194 = arith.mulf %193, %186 : vector<32x128xf32>
    %cst_85 = arith.constant -0.284496725 : f32
    %195 = vector.broadcast %cst_85 : f32 to vector<32x128xf32>
    %196 = arith.addf %194, %195 : vector<32x128xf32>
    %197 = arith.mulf %196, %186 : vector<32x128xf32>
    %cst_86 = arith.constant 0.254829586 : f32
    %198 = vector.broadcast %cst_86 : f32 to vector<32x128xf32>
    %199 = arith.addf %197, %198 : vector<32x128xf32>
    %200 = arith.mulf %199, %186 : vector<32x128xf32>
    %cst_87 = arith.constant 0.000000e+00 : f32
    %201 = vector.broadcast %cst_87 : f32 to vector<32x128xf32>
    %202 = arith.subf %201, %180 : vector<32x128xf32>
    %203 = arith.mulf %202, %180 : vector<32x128xf32>
    %204 = math.exp %203 : vector<32x128xf32>
    %205 = arith.mulf %200, %204 : vector<32x128xf32>
    %cst_88 = arith.constant 1.000000e+00 : f32
    %206 = vector.broadcast %cst_88 : f32 to vector<32x128xf32>
    %207 = arith.subf %206, %205 : vector<32x128xf32>
    %208 = arith.mulf %179, %207 : vector<32x128xf32>
    %cst_89 = arith.constant 1.000000e+00 : f32
    %209 = vector.broadcast %cst_89 : f32 to vector<32x128xf32>
    %210 = arith.addf %209, %208 : vector<32x128xf32>
    %211 = arith.mulf %172, %210 : vector<32x128xf32>
    %212 = arith.truncf %211 : vector<32x128xf32> to vector<32x128xbf16>
    %c0_90 = arith.constant 0 : index
    %c0_91 = arith.constant 0 : index
    %213 = vector.load %arg21[%c0_90, %c0_91] : memref<128x64xbf16, #tpu.memory_space<vmem>>, vector<128x64xbf16>
    %cst_92 = arith.constant dense<0.000000e+00> : vector<32x64xf32>
    %214 = tpu.matmul %212, %213, %cst_92 {dimension_numbers = #tpu.dot_dimension_numbers<[1], [0], [0], [1], [0, 0, 1, 1], [], []>} : vector<32x128xbf16>, vector<128x64xbf16>, vector<32x64xf32> -> vector<32x64xf32>
    %215 = arith.addf %0, %214 : vector<32x64xf32>
    %c0_93 = arith.constant 0 : index
    %c0_94 = arith.constant 0 : index
    %216 = vector.load %arg22[%c0_93, %c0_94] : memref<1x64xf32, #tpu.memory_space<vmem>>, vector<1x64xf32>
    %217 = vector.broadcast %216 : vector<1x64xf32> to vector<32x64xf32>
    %218 = arith.addf %215, %217 : vector<32x64xf32>
    %c0_95 = arith.constant 0 : index
    %c0_96 = arith.constant 0 : index
    %219 = vector.load %arg23[%c0_95, %c0_96] : memref<32x64xf32, #tpu.memory_space<vmem>>, vector<32x64xf32>
    tpu.vector_store %arg23[%c0_95, %c0_96], %218 {strides = array<i32>} : memref<32x64xf32, #tpu.memory_space<vmem>>, vector<32x64xf32>,
    return
  }
  func.func @transform_0(%arg0: i32) -> (i32, i32) {
    %c0_i32 = arith.constant 0 : i32
    %c0_i32_0 = arith.constant 0 : i32
    %c0_i32_1 = arith.constant 0 : i32
    return %c0_i32, %c0_i32_0 : i32, i32
  }
  func.func @transform_1(%arg0: i32) -> (i32, i32) {
    %c0_i32 = arith.constant 0 : i32
    %c0_i32_0 = arith.constant 0 : i32
    %c0_i32_1 = arith.constant 0 : i32
    return %c0_i32, %c0_i32_0 : i32, i32
  }
  func.func @transform_2(%arg0: i32) -> (i32, i32) {
    %c0_i32 = arith.constant 0 : i32
    %c0_i32_0 = arith.constant 0 : i32
    %c0_i32_1 = arith.constant 0 : i32
    return %c0_i32, %c0_i32_0 : i32, i32
  }
  func.func @transform_3(%arg0: i32) -> (i32, i32) {
    %c0_i32 = arith.constant 0 : i32
    %c0_i32_0 = arith.constant 0 : i32
    %c0_i32_1 = arith.constant 0 : i32
    return %c0_i32, %c0_i32_0 : i32, i32
  }
  func.func @transform_4(%arg0: i32) -> (i32, i32) {
    %c0_i32 = arith.constant 0 : i32
    %c0_i32_0 = arith.constant 0 : i32
    %c0_i32_1 = arith.constant 0 : i32
    return %c0_i32, %c0_i32_0 : i32, i32
  }
  func.func @transform_5(%arg0: i32) -> (i32, i32) {
    %c0_i32 = arith.constant 0 : i32
    %c0_i32_0 = arith.constant 0 : i32
    %c0_i32_1 = arith.constant 0 : i32
    return %c0_i32, %c0_i32_0 : i32, i32
  }
  func.func @transform_6(%arg0: i32) -> (i32, i32) {
    %c0_i32 = arith.constant 0 : i32
    %c0_i32_0 = arith.constant 0 : i32
    %c0_i32_1 = arith.constant 0 : i32
    return %c0_i32, %c0_i32_0 : i32, i32
  }
  func.func @transform_7(%arg0: i32) -> (i32, i32) {
    %c0_i32 = arith.constant 0 : i32
    %c0_i32_0 = arith.constant 0 : i32
    %c0_i32_1 = arith.constant 0 : i32
    return %c0_i32, %c0_i32_0 : i32, i32
  }
  func.func @transform_8(%arg0: i32) -> (i32, i32) {
    %c0_i32 = arith.constant 0 : i32
    %c0_i32_0 = arith.constant 0 : i32
    %c0_i32_1 = arith.constant 0 : i32
    return %c0_i32, %c0_i32_0 : i32, i32
  }
  func.func @transform_9(%arg0: i32) -> (i32, i32) {
    %c0_i32 = arith.constant 0 : i32
    %c0_i32_0 = arith.constant 0 : i32
    %c0_i32_1 = arith.constant 0 : i32
    return %c0_i32, %c0_i32_0 : i32, i32
  }
  func.func @transform_10(%arg0: i32) -> (i32, i32) {
    %c0_i32 = arith.constant 0 : i32
    %c0_i32_0 = arith.constant 0 : i32
    %c0_i32_1 = arith.constant 0 : i32
    return %c0_i32, %c0_i32_0 : i32, i32
  }
  func.func @transform_11(%arg0: i32) -> (i32, i32) {
    %c0_i32 = arith.constant 0 : i32
    %c0_i32_0 = arith.constant 0 : i32
    %c0_i32_1 = arith.constant 0 : i32
    return %c0_i32, %c0_i32_0 : i32, i32
  }
  func.func @transform_12(%arg0: i32) -> (i32, i32) {
    %c0_i32 = arith.constant 0 : i32
    %c0_i32_0 = arith.constant 0 : i32
    %c0_i32_1 = arith.constant 0 : i32
    return %c0_i32, %c0_i32_0 : i32, i32
  }
  func.func @transform_13(%arg0: i32) -> (i32, i32) {
    %c0_i32 = arith.constant 0 : i32
    %c0_i32_0 = arith.constant 0 : i32
    %c0_i32_1 = arith.constant 0 : i32
    return %c0_i32, %c0_i32_0 : i32, i32
  }
  func.func @transform_14(%arg0: i32) -> (i32, i32) {
    %c0_i32 = arith.constant 0 : i32
    %c0_i32_0 = arith.constant 0 : i32
    %c0_i32_1 = arith.constant 0 : i32
    return %c0_i32, %c0_i32_0 : i32, i32
  }
  func.func @transform_15(%arg0: i32) -> (i32, i32) {
    %c0_i32 = arith.constant 0 : i32
    %c0_i32_0 = arith.constant 0 : i32
    %c0_i32_1 = arith.constant 0 : i32
    return %c0_i32, %c0_i32_0 : i32, i32
  }
  func.func @transform_16(%arg0: i32) -> (i32, i32) {
    %c0_i32 = arith.constant 0 : i32
    %c0_i32_0 = arith.constant 0 : i32
    %c0_i32_1 = arith.constant 0 : i32
    return %c0_i32, %c0_i32_0 : i32, i32
  }
  func.func @transform_17(%arg0: i32) -> (i32, i32) {
    %c0_i32 = arith.constant 0 : i32
    %c0_i32_0 = arith.constant 0 : i32
    %c0_i32_1 = arith.constant 0 : i32
    return %c0_i32, %c0_i32_0 : i32, i32
  }
  func.func @transform_18(%arg0: i32) -> (i32, i32) {
    %c0_i32 = arith.constant 0 : i32
    %c0_i32_0 = arith.constant 0 : i32
    %c0_i32_1 = arith.constant 0 : i32
    return %c0_i32, %c0_i32_0 : i32, i32
  }
  func.func @transform_19(%arg0: i32) -> (i32, i32) {
    %c0_i32 = arith.constant 0 : i32
    %c0_i32_0 = arith.constant 0 : i32
    %c0_i32_1 = arith.constant 0 : i32
    return %c0_i32, %c0_i32_0 : i32, i32
  }
  func.func @transform_20(%arg0: i32) -> (i32, i32) {
    %c0_i32 = arith.constant 0 : i32
    %c0_i32_0 = arith.constant 0 : i32
    %c0_i32_1 = arith.constant 0 : i32
    return %c0_i32, %c0_i32_0 : i32, i32
  }
  func.func @transform_21(%arg0: i32) -> (i32, i32) {
    %c0_i32 = arith.constant 0 : i32
    %c0_i32_0 = arith.constant 0 : i32
    %c0_i32_1 = arith.constant 0 : i32
    return %c0_i32, %c0_i32_0 : i32, i32
  }
  func.func @transform_22(%arg0: i32) -> (i32, i32) {
    %c0_i32 = arith.constant 0 : i32
    %c0_i32_0 = arith.constant 0 : i32
    %c0_i32_1 = arith.constant 0 : i32
    return %c0_i32, %c0_i32_0 : i32, i32
  }
}

</mosaic_0001>

<bundles_post_ra>
// kernel: squeeze.11
= control target key start
LH: loop header
LB: loop body
LE: loop exit
PB: predicated region body
PF: predicated region fallthrough
CT: control target
= control target key end

     0   :  { %vm7_vm0 = vcmask 261120   ;;  %vm13_vm1 = vcmask 523520   ;;  %s39_s0 = inlined_call_operand.vmem [shape: f32[2,32], index: 0, kind: input, shape index: {}]   ;;  %s40_s1 = inlined_call_operand.vmem [shape: f32[1,64], index: 1, kind: output, shape index: {}]  }
   0x1   :  { %v4_v0 = vld [vmem:[%s39_s0] sm:$0x3]  ;;  %s22_s0 = smov 32  }
   0x2   :  { %5 = vst [vmem:[#allocation1] sm:$0x3] %v4_v0 }
   0x9   :  { %v10_v1 = vld [vmem:[#allocation1 + $0x1] sm:$0x1]   ;;  %v6_v2 = vld [vmem:[#allocation1] sm:$0x1]  }
   0xa   :  { %11 = vrot.lane.b32.xlu0 %v10_v1, %s22_s0  ;;  %8 = vst.msk [vmem:[#allocation0] sm:$0x1] %vm7_vm0, %v6_v2  }
  0x7c   :  { %v12_v3 = vpop.permute.xlu0 %11  }
  0x7d   :  { %14 = vst.msk [vmem:[#allocation0] sm:$0x1] %vm13_vm1, %v12_v3  }
  0x84   :  { %v17_v4 = vld [vmem:[#allocation0] sm:$0x1] }
  0x85   :  { %20 = vst [vmem:[%s40_s1] sm:$0x1] %v17_v4 }

// kernel: tile.11
= control target key start
LH: loop header
LB: loop body
LE: loop exit
PB: predicated region body
PF: predicated region fallthrough
CT: control target
= control target key end

     0   :  { %vm132_vm0 = vcmask 1047556   ;;  %s244_s15 = smov 32   ;;  %vm134_vm1 = vcmask 261120   ;;  %vm171_vm2 = vcmask 523520   ;;  %s387_s0 = inlined_call_operand.vmem [shape: f32[2,1,16,2,32], index: 0, kind: input, shape index: {}]   ;;  %s388_s1 = inlined_call_operand.vmem [shape: f32[32,64], index: 1, kind: output, shape index: {}]  }
   0x1   :  { %v230_v0 = vld [vmem:[%s387_s0 + $0xe] sm:$0x3]  ;;  %v231_v1 = vld [vmem:[%s387_s0 + $0xc] sm:$0x3]  ;;  %v232_v2 = vld [vmem:[%s387_s0 + $0xa] sm:$0x3] }
   0x2   :  { %103 = vst [vmem:[#allocation0 + $0x38] sm:$0x3] %v230_v0  ;;  %v233_v3 = vld [vmem:[%s387_s0 + $0x8] sm:$0x3]  ;;  %v234_v4 = vld [vmem:[%s387_s0 + $0x6] sm:$0x3] }
   0x3   :  { %107 = vst [vmem:[#allocation0 + $0x30] sm:$0x3] %v231_v1  ;;  %v235_v5 = vld [vmem:[%s387_s0 + $0x4] sm:$0x3]  ;;  %v236_v6 = vld [vmem:[%s387_s0 + $0x2] sm:$0x3] }
   0x4   :  { %111 = vst [vmem:[#allocation0 + $0x28] sm:$0x3] %v232_v2  ;;  %v128_v7 = vld [vmem:[%s387_s0] sm:$0x3]  ;;  %v214_v8 = vld [vmem:[%s387_s0 + $0x2e] sm:$0x3] }
   0x5   :  { %115 = vst [vmem:[#allocation0 + $0x20] sm:$0x3] %v233_v3  ;;  %v215_v9 = vld [vmem:[%s387_s0 + $0x2c] sm:$0x3]  ;;  %v216_v10 = vld [vmem:[%s387_s0 + $0x2a] sm:$0x3] }
   0x6   :  { %119 = vst [vmem:[#allocation0 + $0x18] sm:$0x3] %v234_v4  ;;  %v217_v11 = vld [vmem:[%s387_s0 + $0x28] sm:$0x3]  ;;  %v218_v12 = vld [vmem:[%s387_s0 + $0x26] sm:$0x3] }
   0x7   :  { %123 = vst [vmem:[#allocation0 + $0x10] sm:$0x3] %v235_v5  ;;  %v219_v13 = vld [vmem:[%s387_s0 + $0x24] sm:$0x3]  ;;  %v220_v14 = vld [vmem:[%s387_s0 + $0x22] sm:$0x3] }
   0x8   :  { %127 = vst [vmem:[#allocation0 + $0x8] sm:$0x3] %v236_v6  ;;  %v221_v15 = vld [vmem:[%s387_s0 + $0x20] sm:$0x3]  ;;  %v222_v17 = vld [vmem:[%s387_s0 + $0x1e] sm:$0x3] }
   0x9   :  { %129 = vst [vmem:[#allocation0] sm:$0x3] %v128_v7  ;;  %v223_v18 = vld [vmem:[%s387_s0 + $0x1c] sm:$0x3]  ;;  %v224_v21 = vld [vmem:[%s387_s0 + $0x1a] sm:$0x3] }
   0xa   :  { %39 = vst [vmem:[#allocation0 + $0xb8] sm:$0x3] %v214_v8  ;;  %v225_v22 = vld [vmem:[%s387_s0 + $0x18] sm:$0x3]  ;;  %v226_v23 = vld [vmem:[%s387_s0 + $0x16] sm:$0x3] }
   0xb   :  { %43 = vst [vmem:[#allocation0 + $0xb0] sm:$0x3] %v215_v9  ;;  %v227_v24 = vld [vmem:[%s387_s0 + $0x14] sm:$0x3]  ;;  %v228_v25 = vld [vmem:[%s387_s0 + $0x12] sm:$0x3] }
   0xc   :  { %47 = vst [vmem:[#allocation0 + $0xa8] sm:$0x3] %v216_v10  ;;  %v166_v16 = vld [vmem:[#allocation0 + $0x1] ss:$8 sm:$0xf0]  }
   0xd   :  { %51 = vst [vmem:[#allocation0 + $0xa0] sm:$0x3] %v217_v11  ;;  %v229_v26 = vld [vmem:[%s387_s0 + $0x10] sm:$0x3]  ;;  %v206_v28 = vld [vmem:[%s387_s0 + $0x3e] sm:$0x3] }
   0xe   :  { %55 = vst [vmem:[#allocation0 + $0x98] sm:$0x3] %v218_v12  ;;  %v207_v29 = vld [vmem:[%s387_s0 + $0x3c] sm:$0x3]  ;;  %v208_v32 = vld [vmem:[%s387_s0 + $0x3a] sm:$0x3] }
   0xf   :  { %59 = vst [vmem:[#allocation0 + $0x90] sm:$0x3] %v219_v13  ;;  %v209_v33 = vld [vmem:[%s387_s0 + $0x38] sm:$0x3]  ;;  %v210_v34 = vld [vmem:[%s387_s0 + $0x36] sm:$0x3] }
  0x10   :  { %v164_v19 = vld [vmem:[#allocation0 + $0x1] ss:$8 sm:$0xf]   ;;  %63 = vst [vmem:[#allocation0 + $0x88] sm:$0x3] %v220_v14 }
  0x11   :  { %v168_v20 = vsel %vm132_vm0, %v166_v16, %v164_v19  ;;  %67 = vst [vmem:[#allocation0 + $0x80] sm:$0x3] %v221_v15  ;;  %v211_v35 = vld [vmem:[%s387_s0 + $0x34] sm:$0x3]  ;;  %v212_v36 = vld [vmem:[%s387_s0 + $0x32] sm:$0x3] }
  0x12   :  { %169 = vrot.lane.b32.xlu0 %v168_v20, %s244_s15  ;;  %71 = vst [vmem:[#allocation0 + $0x78] sm:$0x3] %v222_v17  ;;  %v213_v37 = vld [vmem:[%s387_s0 + $0x30] sm:$0x3] }
  0x13   :  { %75 = vst [vmem:[#allocation0 + $0x70] sm:$0x3] %v223_v18  ;;  %v130_v44 = vld [vmem:[#allocation0] ss:$8 sm:$0xf]  }
  0x14   :  { %79 = vst [vmem:[#allocation0 + $0x68] sm:$0x3] %v224_v21  ;;  %v187_v27 = vld [vmem:[#allocation0 + $0x81] ss:$8 sm:$0xf0]  }
  0x15   :  { %83 = vst [vmem:[#allocation0 + $0x60] sm:$0x3] %v225_v22  ;;  %v131_v45 = vld [vmem:[#allocation0] ss:$8 sm:$0xf0]  }
  0x16   :  { %87 = vst [vmem:[#allocation0 + $0x58] sm:$0x3] %v226_v23  ;;  %v133_v46 = vsel %vm132_vm0, %v131_v45, %v130_v44  ;;  %v148_v48 = vld [vmem:[#allocation0 + $0x80] ss:$8 sm:$0xf0]  }
  0x17   :  { %91 = vst [vmem:[#allocation0 + $0x50] sm:$0x3] %v227_v24 }
  0x18   :  { %v185_v30 = vld [vmem:[#allocation0 + $0x81] ss:$8 sm:$0xf]   ;;  %95 = vst [vmem:[#allocation0 + $0x48] sm:$0x3] %v228_v25 }
  0x19   :  { %v189_v31 = vsel %vm132_vm0, %v187_v27, %v185_v30  ;;  %99 = vst [vmem:[#allocation0 + $0x40] sm:$0x3] %v229_v26  ;;  %v146_v47 = vld [vmem:[#allocation0 + $0x80] ss:$8 sm:$0xf]  }
  0x1a   :  { %190 = vrot.lane.b32.xlu1 %v189_v31, %s244_s15  ;;  %7 = vst [vmem:[#allocation0 + $0xf8] sm:$0x3] %v206_v28  ;;  %v150_v49 = vsel %vm132_vm0, %v148_v48, %v146_v47 }
  0x1b   :  { %11 = vst [vmem:[#allocation0 + $0xf0] sm:$0x3] %v207_v29 }
  0x1c   :  { %15 = vst [vmem:[#allocation0 + $0xe8] sm:$0x3] %v208_v32  ;;  %v176_v38 = vld [vmem:[#allocation0 + $0x41] ss:$8 sm:$0xf0]  }
  0x1d   :  { %19 = vst [vmem:[#allocation0 + $0xe0] sm:$0x3] %v209_v33  ;;  %v139_v51 = vld [vmem:[#allocation0 + $0x40] ss:$8 sm:$0xf0]  }
  0x1e   :  { %23 = vst [vmem:[#allocation0 + $0xd8] sm:$0x3] %v210_v34 }
  0x1f   :  { %27 = vst [vmem:[#allocation0 + $0xd0] sm:$0x3] %v211_v35 }
  0x20   :  { %v174_v39 = vld [vmem:[#allocation0 + $0x41] ss:$8 sm:$0xf]   ;;  %31 = vst [vmem:[#allocation0 + $0xc8] sm:$0x3] %v212_v36 }
  0x21   :  { %v178_v40 = vsel %vm132_vm0, %v176_v38, %v174_v39  ;;  %35 = vst [vmem:[#allocation0 + $0xc0] sm:$0x3] %v213_v37  ;;  %v137_v50 = vld [vmem:[#allocation0 + $0x40] ss:$8 sm:$0xf]  }
  0x22   :  { %179 = vrot.lane.b32.xlu0 %v178_v40, %s244_s15  ;;  %135 = vst.msk [vmem:[%s388_s1] sm:$0xff] %vm134_vm1, %v133_v46   ;;  %v141_v52 = vsel %vm132_vm0, %v139_v51, %v137_v50 }
  0x23   :  { %238 = vst.msk [vmem:[%s388_s1 + $0x10] sm:$0xff] %vm134_vm1, %v150_v49  }
  0x24   :  { %v198_v41 = vld [vmem:[#allocation0 + $0xc1] ss:$8 sm:$0xf0]   ;;  %237 = vst.msk [vmem:[%s388_s1 + $0x8] sm:$0xff] %vm134_vm1, %v141_v52  }
  0x25   :  { %v157_v54 = vld [vmem:[#allocation0 + $0xc0] ss:$8 sm:$0xf0]  }
  0x28   :  { %v196_v42 = vld [vmem:[#allocation0 + $0xc1] ss:$8 sm:$0xf]   ;;  %v155_v53 = vld [vmem:[#allocation0 + $0xc0] ss:$8 sm:$0xf]  }
  0x29   :  { %v200_v43 = vsel %vm132_vm0, %v198_v41, %v196_v42  ;;  %v159_v55 = vsel %vm132_vm0, %v157_v54, %v155_v53 }
  0x2a   :  { %201 = vrot.lane.b32.xlu1 %v200_v43, %s244_s15  ;;  %239 = vst.msk [vmem:[%s388_s1 + $0x18] sm:$0xff] %vm134_vm1, %v159_v55  }
  0x84   :  { %v170_v56 = vpop.permute.xlu0 %169  }
  0x85   :  { %172 = vst.msk [vmem:[%s388_s1] sm:$0xff] %vm171_vm2, %v170_v56  }
  0x8c   :  { %v191_v57 = vpop.permute.xlu1 %190  }
  0x8d   :  { %241 = vst.msk [vmem:[%s388_s1 + $0x10] sm:$0xff] %vm171_vm2, %v191_v57  }
  0x94   :  { %v180_v58 = vpop.permute.xlu0 %179  }
  0x95   :  { %240 = vst.msk [vmem:[%s388_s1 + $0x8] sm:$0xff] %vm171_vm2, %v180_v58  }
  0x9c   :  { %v202_v59 = vpop.permute.xlu1 %201  }
  0x9d   :  { %242 = vst.msk [vmem:[%s388_s1 + $0x18] sm:$0xff] %vm171_vm2, %v202_v59  }

// kernel: self_block.1
= control target key start
LH: loop header
LB: loop body
LE: loop exit
PB: predicated region body
PF: predicated region fallthrough
CT: control target
= control target key end

     0   :  { %s2092_s0 = inlined_call_operand.vmem [shape: f32[32,64], index: 0, kind: input, shape index: {}]   ;;  %s2093_s1 = inlined_call_operand.vmem [shape: f32[32,64], index: 1, kind: input, shape index: {}]   ;;  %s2094_s2 = inlined_call_operand.vmem [shape: f32[32,64], index: 2, kind: input, shape index: {}]   ;;  %s2095_s3 = inlined_call_operand.vmem [shape: bf16[64,64], index: 3, kind: input, shape index: {}]   ;;  %s2096_s4 = inlined_call_operand.vmem [shape: bf16[64,64], index: 4, kind: input, shape index: {}]   ;;  %s2097_s5 = inlined_call_operand.vmem [shape: bf16[64,64], index: 5, kind: input, shape index: {}]   ;;  %s2098_s6 = inlined_call_operand.vmem [shape: bf16[64,64], index: 6, kind: input, shape index: {}]   ;;  %s2099_s7 = inlined_call_operand.vmem [shape: bf16[64,64], index: 7, kind: input, shape index: {}]   ;;  %s2100_s8 = inlined_call_operand.vmem [shape: f32[1,64], index: 8, kind: input, shape index: {}]   ;;  %s2101_s9 = inlined_call_operand.vmem [shape: f32[1,64], index: 9, kind: input, shape index: {}]   ;;  %s2102_s10 = inlined_call_operand.vmem [shape: f32[1,64], index: 10, kind: input, shape index: {}]   ;;  %s2103_s11 = inlined_call_operand.vmem [shape: f32[1,64], index: 11, kind: input, shape index: {}]   ;;  %s2104_s12 = inlined_call_operand.vmem [shape: f32[1,64], index: 12, kind: input, shape index: {}]   ;;  %s2105_s13 = inlined_call_operand.vmem [shape: bf16[64,64], index: 13, kind: input, shape index: {}]   ;;  %s2106_s14 = inlined_call_operand.vmem [shape: f32[1,64], index: 14, kind: input, shape index: {}]   ;;  %s2107_s15 = inlined_call_operand.vmem [shape: bf16[64,128], index: 15, kind: input, shape index: {}]   ;;  %s2108_s16 = inlined_call_operand.vmem [shape: bf16[64,128], index: 16, kind: input, shape index: {}]   ;;  %s2109_s17 = inlined_call_operand.vmem [shape: f32[1,128], index: 17, kind: input, shape index: {}]   ;;  %s2110_s18 = inlined_call_operand.vmem [shape: f32[1,128], index: 18, kind: input, shape index: {}]   ;;  %s2111_s19 = inlined_call_operand.vmem [shape: f32[1,128], index: 19, kind: input, shape index: {}]   ;;  %s2112_s20 = inlined_call_operand.vmem [shape: bf16[128,64], index: 20, kind: input, shape index: {}]   ;;  %s2113_s21 = inlined_call_operand.vmem [shape: f32[1,64], index: 21, kind: input, shape index: {}]   ;;  %s2114_s22 = inlined_call_operand.hbm [shape: f32[32,64], index: 22, kind: output, shape index: {}]  }
   0x1   :  { %2122 = sst [smem:[#allocation5_spill]] %s2092_s0 }
   0x2   :  { %2123 = sst [smem:[#allocation6_spill]] %s2093_s1 }
   0x3   :  { %2124 = sst [smem:[#allocation7_spill]] %s2094_s2 }
   0x4   :  { %2125 = sst [smem:[#allocation8_spill]] %s2095_s3 }
   0x5   :  { %2126 = sst [smem:[#allocation9_spill]] %s2096_s4 }
   0x6   :  { %2127 = sst [smem:[#allocation10_spill]] %s2097_s5 }
   0x7   :  { %2128 = sst [smem:[#allocation11_spill]] %s2098_s6 }
   0x8   :  { %2129 = sst [smem:[#allocation12_spill]] %s2109_s17 }
   0x9   :  { %s2130_s29 = sld [smem:[#allocation8_spill]] }
   0xa   :  { %s2131_s17 = sld [smem:[#allocation10_spill]] }
   0xb   :  { %s2132_s1 = sld [smem:[#allocation11_spill]] }
   0xc   :  { %s2133_s2 = sld [smem:[#allocation5_spill]] }
   0xf   :  { %v1470_v0 = vld [vmem:[%s2130_s29 + $0x18] sm:$0xff]  ;;  %v1469_v3 = vld [vmem:[%s2130_s29 + $0x10] sm:$0xff]  ;;  %v1468_v6 = vld [vmem:[%s2130_s29 + $0x8] sm:$0xff] }
  0x10   :  { %v1478_v1 = vld [vmem:[%s2131_s17 + $0x18] sm:$0xff]  ;;  %134 = vmatpush.bf16.msra.mxu1 %v1470_v0  ;;  %v1477_v4 = vld [vmem:[%s2131_s17 + $0x10] sm:$0xff]  ;;  %v1476_v7 = vld [vmem:[%s2131_s17 + $0x8] sm:$0xff] }
  0x11   :  { %v1482_v2 = vld [vmem:[%s2132_s1 + $0x18] sm:$0xff]  ;;  %256 = vmatpush.bf16.msra.mxu2 %v1478_v1  ;;  %v1481_v5 = vld [vmem:[%s2132_s1 + $0x10] sm:$0xff]  ;;  %v1480_v8 = vld [vmem:[%s2132_s1 + $0x8] sm:$0xff] }
  0x12   :  { %315 = vmatpush.bf16.msra.mxu3 %v1482_v2  ;;  %v1467_v9 = vld [vmem:[%s2130_s29] sm:$0xff]  ;;  %v74_v12 = vld [vmem:[%s2133_s2 + $0x8] sm:$0xff] }
  0x13   :  { %v1475_v10 = vld [vmem:[%s2131_s17] sm:$0xff] }
  0x14   :  { %135 = vmatpush.bf16.msra.mxu1 %v1469_v3  ;;  %v73_v11 = vld [vmem:[%s2133_s2] sm:$0xff] }
  0x15   :  { %257 = vmatpush.bf16.msra.mxu2 %v1477_v4 }
  0x16   :  { %316 = vmatpush.bf16.msra.mxu3 %v1481_v5 }
  0x18   :  { %136 = vmatpush.bf16.msra.mxu1 %v1468_v6 }
  0x19   :  { %258 = vmatpush.bf16.msra.mxu2 %v1476_v7 }
  0x1a   :  { %27 = vsyncpa [#allocation3], 0  ;;  %317 = vmatpush.bf16.msra.mxu3 %v1480_v8  ;;  %v1479_v13 = vld [vmem:[%s2132_s1] sm:$0xff]  ;;  %s2134_s0 = sld [smem:[#allocation9_spill]]  ;;  %v1777_v15 = vpack.c.bf16 %v74_v12, %v73_v11  ;;  %vm123_vm0 = vcmask 523264   ;;  %v75_v19 = vld [vmem:[%s2133_s2 + $0x10] sm:$0xff] }
  0x1b   :  { %v76_v20 = vld [vmem:[%s2133_s2 + $0x18] sm:$0xff]  ;;  %v1485_v23 = vld [vmem:[%s2099_s7 + $0x10] sm:$0xff]  ;;  %v1484_v24 = vld [vmem:[%s2099_s7 + $0x8] sm:$0xff]  ;;  %s2135_s27 = sld [smem:[#allocation7_spill]]  ;;  %vm404_vm1 = vcmask 261120   ;;  %vm427_vm2 = vcmask 130048  }
  0x1c   :  { %137 = vmatpush.bf16.msra.mxu1 %v1467_v9  ;;  %v1800_v21 = vpack.c.bf16 %v76_v20, %v75_v19  ;;  %v1486_v22 = vld [vmem:[%s2099_s7 + $0x18] sm:$0xff]  ;;  %v1483_v25 = vld [vmem:[%s2099_s7] sm:$0xff]  ;;  %s2136_s30 = sld [smem:[#allocation6_spill]]  ;;  %s1269_s23 = sshll.u32 %s2114_s22, 4  ;;  %s1270_s23 = int_to_ptr.hbm [resolvable:$true] %s1269_s23 }
  0x1d   :  { %259 = vmatpush.bf16.msra.mxu2 %v1475_v10  ;;  %378 = vmatpush.bf16.msra.mxu0 %v1486_v22  ;;  %v1514_v27 = vld [vmem:[%s2102_s10] ss:$0 sm:$0xff]  ;;  %s1615_s5 = smov 128   ;;  %s1616_s24 = smov 8  }
  0x1e   :  { %318 = vmatpush.bf16.msra.mxu3 %v1479_v13  ;;  %v1515_v29 = vld [vmem:[%s2103_s11] ss:$0 sm:$0xff] }
  0x1f   :  { %1297 = vmatmul.msk.bf16.vlgmr.msra.gmra.mxu1 %vm123_vm0, %v1777_v15  ;;  %v1516_v3 = vld [vmem:[%s2101_s9] ss:$0 sm:$0xff] }
  0x20   :  { %v1474_v14 = vld [vmem:[%s2134_s0 + $0x18] sm:$0xff]  ;;  %v1473_v16 = vld [vmem:[%s2134_s0 + $0x10] sm:$0xff]  ;;  %1333 = vmatmul.msk.bf16.vlgmr.msra.gmra.mxu2 %vm123_vm0, %v1777_v15  ;;  %v1472_v17 = vld [vmem:[%s2134_s0 + $0x8] sm:$0xff] }
  0x21   :  { %193 = vmatpush.bf16.msrb.mxu1 %v1474_v14  ;;  %1351 = vmatmul.msk.bf16.vlgmr.msra.gmra.mxu3 %vm123_vm0, %v1777_v15  ;;  %v1471_v18 = vld [vmem:[%s2134_s0] sm:$0xff]  ;;  %v84_v40 = vld [vmem:[%s2135_s27 + $0x8] sm:$0xff]  ;;  %s1611_s0 = smov 96   ;;  %v85_v56 = vld [vmem:[%s2135_s27 + $0x10] sm:$0xff] }
  0x22   :  { %379 = vmatpush.bf16.msra.mxu0 %v1485_v23  ;;  %v83_v34 = vld [vmem:[%s2135_s27] sm:$0xff]  ;;  %v80_v42 = vld [vmem:[%s2136_s30 + $0x8] sm:$0xff]  ;;  %v81_v57 = vld [vmem:[%s2136_s30 + $0x10] sm:$0xff] }
  0x23   :  { %v79_v35 = vld [vmem:[%s2136_s30] sm:$0xff]  ;;  %v86_v62 = vld [vmem:[%s2135_s27 + $0x18] sm:$0xff] }
  0x24   :  { %v82_v0 = vld [vmem:[%s2136_s30 + $0x18] sm:$0xff]  ;;  %v1513_v8 = vld [vmem:[%s2100_s8] ss:$0 sm:$0xff]  ;;  %s2137_s30 = sld [smem:[#allocation12_spill]] }
  0x25   :  { %194 = vmatpush.bf16.msrb.mxu1 %v1473_v16  ;;  %v1517_v10 = vld [vmem:[%s2104_s12] ss:$0 sm:$0xff] }
  0x26   :  { %380 = vmatpush.bf16.msra.mxu0 %v1484_v24 }
  0x29   :  { %195 = vmatpush.bf16.msrb.mxu1 %v1472_v17 }
  0x2a   :  { %381 = vmatpush.bf16.msra.mxu0 %v1483_v25 }
  0x2d   :  { %196 = vmatpush.bf16.msrb.mxu1 %v1471_v18  ;;  %1369 = vmatmul.msk.bf16.vlgmr.msra.gmra.mxu0 %vm123_vm0, %v1777_v15 }
  0x2f   :  { %1298 = vmatmul.msk.bf16.gmra.mxu1 %vm123_vm0, %v1800_v21 }
  0x30   :  { %1334 = vmatmul.msk.bf16.gmra.mxu2 %vm123_vm0, %v1800_v21 }
  0x31   :  { %1352 = vmatmul.msk.bf16.gmra.mxu3 %vm123_vm0, %v1800_v21 }
  0x3d   :  { %1370 = vmatmul.msk.bf16.gmra.mxu0 %vm123_vm0, %v1800_v21 }
  0x3f   :  { %1315 = vmatmul.msk.bf16.vlgmr.msrb.gmra.mxu1 %vm123_vm0, %v1777_v15 }
  0x4f   :  { %1316 = vmatmul.msk.bf16.gmra.mxu1 %vm123_vm0, %v1800_v21 }
  0x9c   :  { %v139_v26 = vpop.f32.mrf.mxu1 }
  0x9d   :  { %v140_v13 = vadd.f32 %v1513_v8, %v139_v26 }
  0x9f   :  { %v149_v24 = vmul.f32 %v140_v13, %v79_v35 }
  0xa3   :  { %v261_v28 = vpop.f32.mrf.mxu2 }
  0xa4   :  { %v320_v30 = vpop.f32.mrf.mxu3  ;;  %v141_v31 = vpop.f32.mrf.mxu1  ;;  %v262_v32 = vadd.f32 %v1514_v27, %v261_v28 }
  0xa5   :  { %v321_v33 = vadd.f32 %v1515_v29, %v320_v30  ;;  %v142_v14 = vadd.f32 %v1513_v8, %v141_v31 }
  0xa6   :  { %v271_v36 = vmul.f32 %v262_v32, %v79_v35 }
  0xa7   :  { %v330_v37 = vmul.f32 %v321_v33, %v83_v34  ;;  %v150_v25 = vmul.f32 %v142_v14, %v80_v42 }
  0xa9   :  { %v334_v47 = vadd.f32 %v330_v37, %v271_v36 }
  0xaa   :  { %v383_v5 = vpop.f32.mrf.mxu0 }
  0xab   :  { %v263_v38 = vpop.f32.mrf.mxu2  ;;  %v384_v18 = vadd.f32 %v1517_v10, %v383_v5 }
  0xac   :  { %v264_v39 = vadd.f32 %v1514_v27, %v263_v38  ;;  %v322_v41 = vpop.f32.mrf.mxu3  ;;  %v144_v44 = vpop.f32.mrf.mxu1 }
  0xad   :  { %v323_v43 = vadd.f32 %v1515_v29, %v322_v41  ;;  %v145_v33 = vadd.f32 %v1513_v8, %v144_v44 }
  0xae   :  { %v272_v45 = vmul.f32 %v264_v39, %v80_v42 }
  0xaf   :  { %v331_v46 = vmul.f32 %v323_v43, %v84_v40  ;;  %v151_v38 = vmul.f32 %v145_v33, %v81_v57 }
  0xb1   :  { %v335_v48 = vadd.f32 %v331_v46, %v272_v45 }
  0xb2   :  { %v385_v22 = vpop.f32.mrf.mxu0 }
  0xb3   :  { %v402_v49 = vpack.c.bf16 %v335_v48, %v334_v47  ;;  %v266_v50 = vpop.f32.mrf.mxu2  ;;  %v386_v23 = vadd.f32 %v1517_v10, %v385_v22 }
  0xb4   :  { %v325_v51 = vpop.f32.mrf.mxu3  ;;  %v146_v52 = vpop.f32.mrf.mxu1  ;;  %v267_v54 = vadd.f32 %v1514_v27, %v266_v50 }
  0xb5   :  { %473 = vrot.lane.b32.xlu0 %v402_v49, %s1611_s0  ;;  %v409_v53 = vsel %vm404_vm1, %v402_v49, 0  ;;  %v326_v55 = vadd.f32 %v1515_v29, %v325_v51  ;;  %v403_v28 = vpack.c.bf16 %v386_v23, %v384_v18 }
  0xb6   :  { %418 = vmatpush.bf16.xpose.msra.mxu1 %v409_v53  ;;  %v273_v58 = vmul.f32 %v267_v54, %v81_v57 }
  0xb7   :  { %v332_v59 = vmul.f32 %v326_v55, %v85_v56  ;;  %517 = vrot.lane.b32.xlu2 %v403_v28, %s1611_s0  ;;  %457 = vmatpush.bf16.msrb.mxu2 %v403_v28  ;;  %v1489_v28 = vld [vmem:[%s2105_s13 + $0x10] sm:$0xff] }
  0xb9   :  { %v336_v7 = vadd.f32 %v332_v59, %v273_v58 }
  0xba   :  { %v388_v47 = vpop.f32.mrf.mxu0 }
  0xbb   :  { %v268_v60 = vpop.f32.mrf.mxu2  ;;  %v389_v44 = vadd.f32 %v1517_v10, %v388_v47 }
  0xbc   :  { %v269_v61 = vadd.f32 %v1514_v27, %v268_v60  ;;  %v327_v63 = vpop.f32.mrf.mxu3  ;;  %v198_v1 = vpop.f32.mrf.mxu1 }
  0xbd   :  { %v328_v2 = vadd.f32 %v1515_v29, %v327_v63  ;;  %v199_v11 = vadd.f32 %v1516_v3, %v198_v1 }
  0xbe   :  { %v274_v4 = vmul.f32 %v269_v61, %v82_v0 }
  0xbf   :  { %v333_v6 = vmul.f32 %v328_v2, %v86_v62  ;;  %v208_v19 = vmul.f32 %v199_v11, %v83_v34  ;;  %v147_v34 = vadd.f32 %v1513_v8, %v146_v52 }
  0xc1   :  { %v337_v9 = vadd.f32 %v333_v6, %v274_v4  ;;  %v212_v29 = vadd.f32 %v208_v19, %v149_v24  ;;  %v152_v39 = vmul.f32 %v147_v34, %v82_v0 }
  0xc2   :  { %v390_v49 = vpop.f32.mrf.mxu0 }
  0xc3   :  { %v1869_v12 = vpack.c.bf16 %v337_v9, %v336_v7  ;;  %v391_v50 = vadd.f32 %v1517_v10, %v390_v49 }
  0xc4   :  { %v200_v16 = vpop.f32.mrf.mxu1 }
  0xc5   :  { %v607_v17 = vsel %vm404_vm1, %v1869_v12, 0  ;;  %v201_v20 = vadd.f32 %v1516_v3, %v200_v16  ;;  %v1879_v51 = vpack.c.bf16 %v391_v50, %v389_v44 }
  0xc6   :  { %616 = vmatpush.bf16.xpose.msrb.mxu0 %v607_v17 }
  0xc7   :  { %v209_v27 = vmul.f32 %v201_v20, %v84_v40 }
  0xc9   :  { %v213_v30 = vadd.f32 %v209_v27, %v150_v25  ;;  %v1490_v27 = vld [vmem:[%s2105_s13 + $0x18] sm:$0xff] }
  0xca   :  { %563 = vmatpush.bf16.msra.mxu2 %v1490_v27 }
  0xcb   :  { %v401_v26 = vpack.c.bf16 %v213_v30, %v212_v29 }
  0xcc   :  { %v203_v31 = vpop.f32.mrf.mxu1 }
  0xcd   :  { %470 = vrot.lane.b32.xlu0 %v401_v26, %s1611_s0  ;;  %1371 = vmatmul.msk.bf16.vlgmr.msra.gmra.mxu1 %vm404_vm1, %v401_v26  ;;  %v204_v32 = vadd.f32 %v1516_v3, %v203_v31 }
  0xce   :  { %748 = vmatpush.bf16.msra.mxu0 %v1490_v27  ;;  %564 = vmatpush.bf16.msra.mxu2 %v1489_v28 }
  0xcf   :  { %v210_v37 = vmul.f32 %v204_v32, %v85_v56 }
  0xd1   :  { %v214_v41 = vadd.f32 %v210_v37, %v151_v38  ;;  %v1488_v38 = vld [vmem:[%s2105_s13 + $0x8] sm:$0xff] }
  0xd2   :  { %749 = vmatpush.bf16.msra.mxu0 %v1489_v28 }
  0xd4   :  { %v205_v36 = vpop.f32.mrf.mxu1 }
  0xd5   :  { %v206_v35 = vadd.f32 %v1516_v3, %v205_v36 }
  0xd7   :  { %v211_v40 = vmul.f32 %v206_v35, %v86_v62 }
  0xd9   :  { %v215_v42 = vadd.f32 %v211_v40, %v152_v39  ;;  %v1487_v40 = vld [vmem:[%s2105_s13] sm:$0xff] }
  0xdb   :  { %v600_v43 = vpack.c.bf16 %v215_v42, %v214_v41 }
  0xdd   :  { %1393 = vmatmul.msk.bf16.vlgmr.msrb.gmra.mxu0 %vm404_vm1, %v600_v43 }
 0x111   :  { %v518_v52 = vpop.permute.xlu2 %517 }
 0x112   :  { %530 = vmatpush.bf16.msrb.mxu1 %v518_v52 }
 0x116   :  { %654 = vmatpush.bf16.msra.mxu1 %v1879_v51 }
 0x127   :  { %v474_v45 = vpop.permute.xlu0 %473 }
 0x128   :  { %v479_v46 = vsel %vm404_vm1, %v474_v45, 0 }
 0x129   :  { %488 = vmatpush.bf16.xpose.msrb.mxu3 %v479_v46 }
 0x131   :  { %592 = vmatpush.bf16.msra.mxu3 %v1488_v38 }
 0x135   :  { %593 = vmatpush.bf16.msra.mxu3 %v1487_v40 }
 0x13f   :  { %v471_v48 = vpop.permute.xlu0 %470 }
 0x140   :  { %1373 = vmatmul.msk.bf16.vlgmr.msrb.gmra.mxu3 %vm404_vm1, %v471_v48 }
 0x14a   :  { %v420_v53 = vpop.f32.mrf.mxu1 }
 0x14b   :  { %v425_v54 = vmul.f32 0.17677669, %v420_v53 }
 0x14d   :  { %v428_v55 = vsel %vm427_vm2, %v425_v54, -inf }
 0x14e   :  { %429 = vmax.xlane.f32.xlu2 %v428_v55 }
 0x152   :  { %v422_v56 = vpop.f32.mrf.mxu1 }
 0x153   :  { %v426_v57 = vmul.f32 0.17677669, %v422_v56 }
 0x155   :  { %v431_v58 = vsel %vm427_vm2, %v426_v57, -inf }
 0x156   :  { %432 = vmax.xlane.f32.xlu0 %v431_v58 }
 0x15a   :  { %v618_v55 = vpop.f32.mrf.mxu0 }
 0x15b   :  { %v623_v58 = vmul.f32 0.17677669, %v618_v55 }
 0x166   :  { %667 = vrot.lane.b32.xlu2 %v600_v43, %s1611_s0 }
 0x1c1   :  { %v430_v59 = vpop.xlane.xlu2 %429 }
 0x1c2   :  { %v434_v62 = vsub.f32 %v425_v54, %v430_v59 }
 0x1c3   :  { %v490_v60 = vpop.f32.mrf.mxu3 }
 0x1c4   :  { %v495_v61 = vmul.f32 0.17677669, %v490_v60  ;;  %v436_v0 = vmul.f32 1.442695, %v434_v62 }
 0x1c6   :  { %v497_v63 = vsel %vm427_vm2, %v495_v61, -inf  ;;  %1523 = vpow2.f32 %v436_v0  ;;  %v620_v0 = vpop.f32.mrf.mxu0 }
 0x1c7   :  { %498 = vmax.xlane.f32.xlu1 %v497_v63  ;;  %v625_v63 = vsel %vm427_vm2, %v623_v58, -inf }
 0x1c9   :  { %v433_v1 = vpop.xlane.xlu0 %432  ;;  %v668_v39 = vpop.permute.xlu2 %667 }
 0x1ca   :  { %v435_v2 = vsub.f32 %v426_v57, %v433_v1  ;;  %v1498_v57 = vld [vmem:[%s2108_s16 + $0x18] sm:$0xff]  ;;  %v1496_v1 = vld [vmem:[%s2108_s16 + $0x8] sm:$0xff] }
 0x1cb   :  { %v492_v3 = vpop.f32.mrf.mxu3 }
 0x1cc   :  { %v438_v4 = vmul.f32 1.442695, %v435_v2  ;;  %v496_v5 = vmul.f32 0.17677669, %v492_v3  ;;  %v1524_v7 = vpop.eup %1523  ;;  %v624_v2 = vmul.f32 0.17677669, %v620_v0 }
 0x1cd   :  { %v440_v25 = vsel %vm427_vm2, %v1524_v7, 0.0  ;;  %v1495_v3 = vld [vmem:[%s2108_s16] sm:$0xff] }
 0x1ce   :  { %1525 = vpow2.f32 %v438_v4  ;;  %v500_v6 = vsel %vm427_vm2, %v496_v5, -inf  ;;  %v628_v4 = vsel %vm427_vm2, %v624_v2, -inf }
 0x1cf   :  { %501 = vmax.xlane.f32.xlu1 %v500_v6 }
 0x1d4   :  { %v1526_v8 = vpop.eup %1525 }
 0x1d5   :  { %v443_v9 = vsel %vm427_vm2, %v1526_v8, 0.0  ;;  %v446_v10 = vpack.c.bf16 %v1526_v8, %v1524_v7  ;;  %v1932_v7 = vld [vmem:[%s2106_s14] ss:$0 sm:$0xff] }
 0x1d6   :  { %444 = vadd.xlane.f32.xlu0 %v443_v9 }
 0x1d7   :  { %1372 = vmatmul.msk.bf16.vlgmr.msrb.gmra.mxu2 %vm427_vm2, %v446_v10 }
 0x23a   :  { %v499_v11 = vpop.xlane.xlu1 %498 }
 0x23b   :  { %v503_v13 = vsub.f32 %v495_v61, %v499_v11  ;;  %v1497_v61 = vld [vmem:[%s2108_s16 + $0x10] sm:$0xff] }
 0x23d   :  { %v505_v14 = vmul.f32 1.442695, %v503_v13 }
 0x23f   :  { %1527 = vpow2.f32 %v505_v14 }
 0x242   :  { %v502_v16 = vpop.xlane.xlu1 %501 }
 0x243   :  { %v504_v17 = vsub.f32 %v496_v5, %v502_v16 }
 0x245   :  { %v1528_v18 = vpop.eup %1527  ;;  %v507_v19 = vmul.f32 1.442695, %v504_v17 }
 0x246   :  { %v509_v20 = vsel %vm427_vm2, %v1528_v18, 0.0 }
 0x247   :  { %1529 = vpow2.f32 %v507_v19  ;;  %510 = vadd.xlane.f32.xlu1 %v509_v20 }
 0x249   :  { %v445_v42 = vpop.xlane.xlu0 %444 }
 0x24d   :  { %v1530_v22 = vpop.eup %1529 }
 0x24e   :  { %v515_v23 = vpack.c.bf16 %v1530_v22, %v1528_v18  ;;  %v512_v24 = vsel %vm427_vm2, %v1530_v22, 0.0 }
 0x24f   :  { %513 = vadd.xlane.f32.xlu1 %v512_v24 }
 0x250   :  { %1374 = vmatmul.msk.bf16.vlgmr.msrb.gmra.mxu1 %vm427_vm2, %v515_v23 }
 0x251   :  { %765 = vmatpush.bf16.msrb.mxu1 %v1488_v38  ;;  %v1493_v38 = vld [vmem:[%s2107_s15 + $0x10] sm:$0xff] }
 0x255   :  { %766 = vmatpush.bf16.msrb.mxu1 %v1487_v40  ;;  %v1491_v40 = vld [vmem:[%s2107_s15] sm:$0xff] }
 0x25a   :  { %v459_v41 = vpop.f32.mrf.mxu2 }
 0x262   :  { %v461_v45 = vpop.f32.mrf.mxu2 }
 0x268   :  { %670 = vrot.lane.b32.xlu1 %v1869_v12, %s1611_s0 }
 0x292   :  { %441 = vadd.xlane.f32.xlu1 %v440_v25 }
 0x2ba   :  { %v511_v29 = vpop.xlane.xlu1 %510 }
 0x2bb   :  { %1531 = vrcp.f32 %v511_v29 }
 0x2c1   :  { %v1532_v12 = vpop.eup %1531 }
 0x2c2   :  { %v514_v30 = vpop.xlane.xlu1 %513 }
 0x2c3   :  { %1533 = vrcp.f32 %v514_v30 }
 0x2c4   :  { %1535 = vrcp.f32 %v445_v42 }
 0x2c9   :  { %v1534_v31 = vpop.eup %1533 }
 0x2ca   :  { %v1536_v46 = vpop.eup %1535 }
 0x2cb   :  { %v467_v48 = vmul.f32 %v1536_v46, %v461_v45 }
 0x2cd   :  { %v532_v26 = vpop.f32.mrf.mxu1 }
 0x2ce   :  { %v539_v33 = vmul.f32 %v1532_v12, %v532_v26 }
 0x2d5   :  { %v534_v32 = vpop.f32.mrf.mxu1 }
 0x2d6   :  { %v540_v34 = vmul.f32 %v1534_v31, %v534_v32 }
 0x2d8   :  { %v541_v36 = vpack.c.bf16 %v540_v34, %v539_v33 }
 0x2da   :  { %v671_v37 = vpop.permute.xlu1 %670  ;;  %1383 = vmatmul.msk.bf16.vlgmr.msra.gmra.mxu2 %vm404_vm1, %v541_v36  ;;  %v1494_v36 = vld [vmem:[%s2107_s15 + $0x18] sm:$0xff] }
 0x2db   :  { %v676_v35 = vsel %vm404_vm1, %v671_v37, 0 }
 0x2dc   :  { %685 = vmatpush.bf16.xpose.msrb.mxu2 %v676_v35 }
 0x2e4   :  { %833 = vmatpush.bf16.msra.mxu2 %v1498_v57 }
 0x2e8   :  { %834 = vmatpush.bf16.msra.mxu2 %v1497_v61 }
 0x2ea   :  { %1395 = vmatmul.msk.bf16.vlgmr.msrb.gmra.mxu2 %vm404_vm1, %v668_v39  ;;  %v1492_v39 = vld [vmem:[%s2107_s15 + $0x8] sm:$0xff] }
 0x2ec   :  { %835 = vmatpush.bf16.msra.mxu2 %v1496_v1 }
 0x2f0   :  { %836 = vmatpush.bf16.msra.mxu2 %v1495_v3 }
 0x305   :  { %v442_v43 = vpop.xlane.xlu1 %441 }
 0x306   :  { %1537 = vrcp.f32 %v442_v43 }
 0x30c   :  { %v1538_v47 = vpop.eup %1537 }
 0x30d   :  { %v466_v49 = vmul.f32 %v1538_v47, %v459_v41 }
 0x30f   :  { %v468_v44 = vpack.c.bf16 %v467_v48, %v466_v49 }
 0x311   :  { %1392 = vmatmul.msk.bf16.vlgmr.msra.gmra.mxu3 %vm404_vm1, %v468_v44 }
 0x35d   :  { %v566_v50 = vpop.f32.mrf.mxu2 }
 0x365   :  { %v568_v52 = vpop.f32.mrf.mxu2 }
 0x36d   :  { %v687_v53 = vpop.f32.mrf.mxu2 }
 0x36e   :  { %v692_v54 = vmul.f32 0.17677669, %v687_v53 }
 0x370   :  { %v694_v56 = vsel %vm427_vm2, %v692_v54, -inf }
 0x371   :  { %695 = vmax.xlane.f32.xlu0 %v694_v56 }
 0x375   :  { %v689_v59 = vpop.f32.mrf.mxu2 }
 0x376   :  { %v693_v60 = vmul.f32 0.17677669, %v689_v59  ;;  %v1519_v59 = vld [vmem:[%s2137_s30] ss:$0 sm:$0xff]  ;;  %s1614_s30 = smov [#allocation2]  }
 0x377   :  { %s1267_s11 = sshll.u32 %s1614_s30, 4  ;;  %s1268_s11 = int_to_ptr.vmem [resolvable:$true] %s1267_s11 }
 0x378   :  { %v697_v62 = vsel %vm427_vm2, %v693_v60, -inf }
 0x379   :  { %698 = vmax.xlane.f32.xlu2 %v697_v62  ;;  %626 = vmax.xlane.f32.xlu0 %v625_v63 }
 0x381   :  { %629 = vmax.xlane.f32.xlu0 %v628_v4 }
 0x394   :  { %v595_v5 = vpop.f32.mrf.mxu3 }
 0x395   :  { %714 = vrot.lane.b32.xlu0 %v1879_v51, %s1611_s0  ;;  %v596_v6 = vadd.f32 %v595_v5, %v566_v50 }
 0x397   :  { %v777_v10 = vadd.f32 %v1932_v7, %v596_v6 }
 0x39c   :  { %v597_v8 = vpop.f32.mrf.mxu3 }
 0x39d   :  { %v598_v9 = vadd.f32 %v597_v8, %v568_v52 }
 0x39f   :  { %v778_v11 = vadd.f32 %v1932_v7, %v598_v9 }
 0x3a1   :  { %v789_v13 = vpack.c.bf16 %v778_v11, %v777_v10 }
 0x3a3   :  { %1415 = vmatmul.msk.bf16.vlgmr.msra.gmra.mxu2 %vm123_vm0, %v789_v13 }
 0x3e4   :  { %v696_v14 = vpop.xlane.xlu0 %695 }
 0x3e5   :  { %v700_v16 = vsub.f32 %v692_v54, %v696_v14  ;;  %v1612_v14 = vmov 128.0  }
 0x3e7   :  { %v702_v17 = vmul.f32 1.442695, %v700_v16 }
 0x3e9   :  { %1539 = vpow2.f32 %v702_v17 }
 0x3ec   :  { %v699_v51 = vpop.xlane.xlu2 %698  ;;  %v627_v18 = vpop.xlane.xlu0 %626 }
 0x3ed   :  { %v701_v19 = vsub.f32 %v693_v60, %v699_v51  ;;  %v631_v20 = vsub.f32 %v623_v58, %v627_v18 }
 0x3ef   :  { %v1540_v22 = vpop.eup %1539  ;;  %v704_v23 = vmul.f32 1.442695, %v701_v19  ;;  %v633_v24 = vmul.f32 1.442695, %v631_v20 }
 0x3f0   :  { %v706_v25 = vsel %vm427_vm2, %v1540_v22, 0.0 }
 0x3f1   :  { %1541 = vpow2.f32 %v704_v23  ;;  %707 = vadd.xlane.f32.xlu0 %v706_v25 }
 0x3f2   :  { %1543 = vpow2.f32 %v633_v24 }
 0x3f4   :  { %v630_v27 = vpop.xlane.xlu0 %629 }
 0x3f5   :  { %v632_v28 = vsub.f32 %v624_v2, %v630_v27 }
 0x3f7   :  { %v1542_v29 = vpop.eup %1541  ;;  %v635_v30 = vmul.f32 1.442695, %v632_v28 }
 0x3f8   :  { %v1544_v26 = vpop.eup %1543  ;;  %v709_v12 = vsel %vm427_vm2, %v1542_v29, 0.0  ;;  %v712_v35 = vpack.c.bf16 %v1542_v29, %v1540_v22 }
 0x3f9   :  { %1545 = vpow2.f32 %v635_v30  ;;  %710 = vadd.xlane.f32.xlu2 %v709_v12  ;;  %v637_v31 = vsel %vm427_vm2, %v1544_v26, 0.0 }
 0x3fa   :  { %638 = vadd.xlane.f32.xlu1 %v637_v31 }
 0x3ff   :  { %v1546_v32 = vpop.eup %1545 }
 0x400   :  { %v643_v33 = vpack.c.bf16 %v1546_v32, %v1544_v26  ;;  %v640_v34 = vsel %vm427_vm2, %v1546_v32, 0.0 }
 0x402   :  { %641 = vadd.xlane.f32.xlu1 %v640_v34  ;;  %1394 = vmatmul.msk.bf16.vlgmr.msra.gmra.mxu1 %vm427_vm2, %v643_v33 }
 0x407   :  { %v715_v37 = vpop.permute.xlu0 %714 }
 0x408   :  { %727 = vmatpush.bf16.msrb.mxu3 %v715_v37 }
 0x40b   :  { %1396 = vmatmul.msk.bf16.vlgmr.msrb.gmra.mxu3 %vm427_vm2, %v712_v35 }
 0x40c   :  { %876 = vmatpush.bf16.msra.mxu3 %v1494_v36 }
 0x410   :  { %877 = vmatpush.bf16.msra.mxu3 %v1493_v38 }
 0x414   :  { %878 = vmatpush.bf16.msra.mxu3 %v1492_v39 }
 0x418   :  { %879 = vmatpush.bf16.msra.mxu3 %v1491_v40 }
 0x41b   :  { %1433 = vmatmul.msk.bf16.vlgmr.msra.gmra.mxu3 %vm123_vm0, %v1777_v15 }
 0x426   :  { %v838_v58 = vpop.f32.mrf.mxu2 }
 0x42b   :  { %1434 = vmatmul.msk.bf16.gmra.mxu3 %vm123_vm0, %v1800_v21 }
 0x42e   :  { %v840_v63 = vpop.f32.mrf.mxu2 }
 0x464   :  { %v708_v50 = vpop.xlane.xlu0 %707 }
 0x46c   :  { %v711_v52 = vpop.xlane.xlu2 %710 }
 0x46d   :  { %v639_v41 = vpop.xlane.xlu1 %638 }
 0x46e   :  { %1547 = vrcp.f32 %v639_v41 }
 0x474   :  { %v1548_v45 = vpop.eup %1547 }
 0x475   :  { %v642_v42 = vpop.xlane.xlu1 %641 }
 0x476   :  { %1549 = vrcp.f32 %v642_v42 }
 0x477   :  { %1551 = vrcp.f32 %v708_v50 }
 0x478   :  { %1553 = vrcp.f32 %v711_v52 }
 0x479   :  { %1555 = vrcp.f32 %v1612_v14 }
 0x47c   :  { %v1550_v46 = vpop.eup %1549 }
 0x47d   :  { %v1552_v15 = vpop.eup %1551 }
 0x47e   :  { %v1554_v21 = vpop.eup %1553 }
 0x47f   :  { %v656_v43 = vpop.f32.mrf.mxu1  ;;  %v1556_v16 = vpop.eup %1555 }
 0x480   :  { %v663_v48 = vmul.f32 %v1548_v45, %v656_v43  ;;  %v908_v17 = vmul.f32 128.0, %v1556_v16  ;;  %vm912_vm3 = vweird.f32 %v1556_v16  ;;  %v1506_v45 = vld [vmem:[%s2112_s20 + $0x38] sm:$0xff] }
 0x481   :  { %1228 = vmatpush.bf16.msrb.mxu0 %v1506_v45 }
 0x482   :  { %v909_v51 = vsub.f32 1.0, %v908_v17 }
 0x484   :  { %v910_v18 = vmul.f32 %v1556_v16, %v909_v51 }
 0x486   :  { %v911_v19 = vadd.f32 %v1556_v16, %v910_v18 }
 0x487   :  { %v658_v47 = vpop.f32.mrf.mxu1 }
 0x488   :  { %v664_v49 = vmul.f32 %v1550_v46, %v658_v47  ;;  %v1967_v22 = vsel %vm912_vm3, %v1556_v16, %v911_v19 }
 0x48a   :  { %v665_v44 = vpack.c.bf16 %v664_v49, %v663_v48  ;;  %v1505_v48 = vld [vmem:[%s2112_s20 + $0x30] sm:$0xff] }
 0x48b   :  { %1229 = vmatpush.bf16.msrb.mxu0 %v1505_v48 }
 0x48c   :  { %1398 = vmatmul.msk.bf16.vlgmr.msrb.gmra.mxu1 %vm404_vm1, %v665_v44  ;;  %v1504_v44 = vld [vmem:[%s2112_s20 + $0x28] sm:$0xff] }
 0x48e   :  { %v729_v53 = vpop.f32.mrf.mxu3 }
 0x48f   :  { %v736_v55 = vmul.f32 %v1552_v15, %v729_v53  ;;  %1230 = vmatpush.bf16.msrb.mxu0 %v1504_v44 }
 0x496   :  { %v731_v54 = vpop.f32.mrf.mxu3 }
 0x497   :  { %v737_v56 = vmul.f32 %v1554_v21, %v731_v54  ;;  %v1503_v21 = vld [vmem:[%s2112_s20 + $0x20] sm:$0xff] }
 0x498   :  { %1231 = vmatpush.bf16.msrb.mxu0 %v1503_v21 }
 0x499   :  { %v738_v57 = vpack.c.bf16 %v737_v56, %v736_v55  ;;  %v1502_v56 = vld [vmem:[%s2112_s20 + $0x18] sm:$0xff] }
 0x49b   :  { %1397 = vmatmul.msk.bf16.vlgmr.msra.gmra.mxu0 %vm404_vm1, %v738_v57 }
 0x49c   :  { %1232 = vmatpush.bf16.msrb.mxu0 %v1502_v56 }
 0x49e   :  { %v881_v60 = vpop.f32.mrf.mxu3 }
 0x49f   :  { %v882_v61 = vadd.f32 %v881_v60, %v838_v58  ;;  %v1501_v60 = vld [vmem:[%s2112_s20 + $0x10] sm:$0xff] }
 0x4a0   :  { %1233 = vmatpush.bf16.msrb.mxu0 %v1501_v60 }
 0x4a1   :  { %v895_v62 = vadd.f32 %v1519_v59, %v882_v61 }
 0x4a3   :  { %899 = vadd.xlane.f32.xlu1 %v895_v62 }
 0x4a6   :  { %v883_v0 = vpop.f32.mrf.mxu3 }
 0x4a7   :  { %v884_v1 = vadd.f32 %v883_v0, %v840_v63  ;;  %v2008_v63 = vld [vmem:[%s2110_s18] ss:$0 sm:$0xff] }
 0x4a9   :  { %v896_v2 = vadd.f32 %v1519_v59, %v884_v1 }
 0x4ab   :  { %901 = vadd.xlane.f32.xlu2 %v896_v2 }
 0x4ae   :  { %v886_v20 = vpop.f32.mrf.mxu3 }
 0x4b6   :  { %v888_v26 = vpop.f32.mrf.mxu3 }
 0x509   :  { %v768_v3 = vpop.f32.mrf.mxu1 }
 0x511   :  { %v770_v6 = vpop.f32.mrf.mxu1 }
 0x516   :  { %v900_v23 = vpop.xlane.xlu1 %899 }
 0x517   :  { %v914_v27 = vmul.f32 %v1967_v22, %v900_v23 }
 0x518   :  { %v751_v4 = vpop.f32.mrf.mxu0 }
 0x519   :  { %v769_v5 = vadd.f32 %v768_v3, %v751_v4  ;;  %v918_v28 = vsub.f32 %v895_v62, %v914_v27  ;;  %v1500_v3 = vld [vmem:[%s2112_s20 + $0x8] sm:$0xff]  ;;  %v2016_v4 = vld [vmem:[%s2111_s19] ss:$0 sm:$0xff] }
 0x51a   :  { %1234 = vmatpush.bf16.msrb.mxu0 %v1500_v3 }
 0x51b   :  { %v779_v10 = vadd.f32 %v1932_v7, %v769_v5  ;;  %v922_v32 = vmul.f32 %v918_v28, %v918_v28 }
 0x51e   :  { %v902_v29 = vpop.xlane.xlu2 %901 }
 0x51f   :  { %v915_v31 = vmul.f32 %v1967_v22, %v902_v29 }
 0x520   :  { %v753_v8 = vpop.f32.mrf.mxu0 }
 0x521   :  { %v771_v9 = vadd.f32 %v770_v6, %v753_v8  ;;  %v1971_v34 = vsub.f32 %v896_v2, %v915_v31 }
 0x523   :  { %v780_v11 = vadd.f32 %v1932_v7, %v771_v9  ;;  %v923_v36 = vmul.f32 %v1971_v34, %v1971_v34  ;;  %v1499_v9 = vld [vmem:[%s2112_s20] sm:$0xff] }
 0x524   :  { %1235 = vmatpush.bf16.msrb.mxu0 %v1499_v9 }
 0x525   :  { %v790_v13 = vpack.c.bf16 %v780_v11, %v779_v10 }
 0x527   :  { %1416 = vmatmul.msk.bf16.gmra.mxu2 %vm123_vm0, %v790_v13 }
 0x5aa   :  { %v843_v24 = vpop.f32.mrf.mxu2 }
 0x5ab   :  { %v887_v25 = vadd.f32 %v886_v20, %v843_v24 }
 0x5ad   :  { %v897_v7 = vadd.f32 %v1519_v59, %v887_v25 }
 0x5af   :  { %903 = vadd.xlane.f32.xlu1 %v897_v7 }
 0x5b2   :  { %v845_v30 = vpop.f32.mrf.mxu2 }
 0x5b3   :  { %v889_v12 = vadd.f32 %v888_v26, %v845_v30 }
 0x5b5   :  { %v898_v33 = vadd.f32 %v1519_v59, %v889_v12 }
 0x5b7   :  { %926 = vadd.xlane.f32.xlu1 %v922_v32  ;;  %905 = vadd.xlane.f32.xlu2 %v898_v33 }
 0x5bf   :  { %928 = vadd.xlane.f32.xlu2 %v923_v36 }
 0x622   :  { %v904_v37 = vpop.xlane.xlu1 %903 }
 0x623   :  { %v916_v35 = vmul.f32 %v1967_v22, %v904_v37 }
 0x625   :  { %v1976_v38 = vsub.f32 %v897_v7, %v916_v35 }
 0x627   :  { %v924_v39 = vmul.f32 %v1976_v38, %v1976_v38 }
 0x629   :  { %930 = vadd.xlane.f32.xlu1 %v924_v39 }
 0x62a   :  { %v927_v40 = vpop.xlane.xlu1 %926  ;;  %v906_v41 = vpop.xlane.xlu2 %905 }
 0x62b   :  { %v934_v42 = vmul.f32 %v927_v40, %v1967_v22  ;;  %v917_v43 = vmul.f32 %v1967_v22, %v906_v41 }
 0x62d   :  { %v938_v46 = vadd.f32 1e-05, %v934_v42  ;;  %v1985_v47 = vsub.f32 %v898_v33, %v917_v43 }
 0x62f   :  { %1557 = vrsqrt.f32 %v938_v46  ;;  %v925_v49 = vmul.f32 %v1985_v47, %v1985_v47  ;;  %vm948_vm5 = vweird.f32 %v938_v46 }
 0x631   :  { %932 = vadd.xlane.f32.xlu2 %v925_v49 }
 0x632   :  { %v929_v50 = vpop.xlane.xlu2 %928 }
 0x633   :  { %v935_v52 = vmul.f32 %v929_v50, %v1967_v22 }
 0x635   :  { %v1558_v53 = vpop.eup %1557  ;;  %v939_v15 = vadd.f32 1e-05, %v935_v52 }
 0x636   :  { %v943_v54 = vmul.f32 %v1558_v53, %v938_v46  ;;  %vm949_vm4 = vweird.f32 %v1558_v53 }
 0x637   :  { %1559 = vrsqrt.f32 %v939_v15  ;;  %vm950_vm6 = vmor %vm948_vm5, %vm949_vm4  ;;  %vm958_vm8 = vweird.f32 %v939_v15 }
 0x638   :  { %v944_v55 = vmul.f32 %v1558_v53, %v943_v54 }
 0x63a   :  { %v945_v57 = vmul.f32 0.5, %v944_v55 }
 0x63c   :  { %v946_v58 = vsub.f32 1.5, %v945_v57 }
 0x63d   :  { %v1560_v59 = vpop.eup %1559 }
 0x63e   :  { %v947_v61 = vmul.f32 %v1558_v53, %v946_v58  ;;  %v953_v62 = vmul.f32 %v1560_v59, %v939_v15  ;;  %vm959_vm7 = vweird.f32 %v1560_v59 }
 0x63f   :  { %vm960_vm9 = vmor %vm958_vm8, %vm959_vm7 }
 0x640   :  { %v951_v0 = vsel %vm950_vm6, %v1558_v53, %v947_v61  ;;  %v954_v1 = vmul.f32 %v1560_v59, %v953_v62 }
 0x641   :  { %v982_v2 = vmul.f32 %v951_v0, %v918_v28 }
 0x642   :  { %v955_v5 = vmul.f32 0.5, %v954_v1 }
 0x643   :  { %v990_v6 = vmul.f32 %v2008_v63, %v982_v2 }
 0x644   :  { %v956_v8 = vsub.f32 1.5, %v955_v5 }
 0x645   :  { %v2023_v10 = vadd.f32 %v2016_v4, %v990_v6 }
 0x646   :  { %v957_v11 = vmul.f32 %v1560_v59, %v956_v8 }
 0x647   :  { %v2026_v13 = vmul.f32 0.70710677, %v2023_v10 }
 0x648   :  { %v961_v14 = vsel %vm960_vm9, %v1560_v59, %v957_v11 }
 0x649   :  { %v983_v16 = vmul.f32 %v961_v14, %v1971_v34  ;;  %v1018_v17 = vand.u32 2147483647, %v2026_v13  ;;  %vm1010_vm3 = vcmp.ge.f32.partialorder %v2026_v13, 0.0 }
 0x64b   :  { %v991_v51 = vmul.f32 %v2008_v63, %v983_v16  ;;  %v1022_v18 = vmul.f32 0.3275911, %v1018_v17  ;;  %v1126_v35 = vsub.f32 0.0, %v1018_v17 }
 0x64d   :  { %v2032_v19 = vadd.f32 %v2016_v4, %v991_v51  ;;  %v1026_v20 = vadd.f32 1.0, %v1022_v18  ;;  %v1130_v46 = vmul.f32 %v1126_v35, %v1018_v17  ;;  %v1613_v17 = vmov -1.0  }
 0x64e   :  { %v1014_v51 = vsel %vm1010_vm3, 1.0, %v1613_v17 }
 0x64f   :  { %v2035_v23 = vmul.f32 0.70710677, %v2032_v19  ;;  %1561 = vrcp.f32 %v1026_v20  ;;  %v1041_v30 = vand.u32 2147483648, %v1026_v20  ;;  %v1039_v12 = vand.u32 2147483647, %v1026_v20 }
 0x650   :  { %vm1035_vm11 = vweird.f32 %v1026_v20  ;;  %v1134_v21 = vmul.f32 1.442695, %v1130_v46  ;;  %v1003_v13 = vmul.f32 0.5, %v2032_v19 }
 0x651   :  { %v1019_v24 = vand.u32 2147483647, %v2035_v23  ;;  %v1042_v33 = vor.u32 1.1754944e-38, %v1041_v30  ;;  %vm1040_vm13 = vcmp.eq.f32.partialorder %v1039_v12, 8.507059e+37  ;;  %vm1011_vm4 = vcmp.ge.f32.partialorder %v2035_v23, 0.0 }
 0x653   :  { %v1023_v25 = vmul.f32 0.3275911, %v1019_v24  ;;  %v1127_v15 = vsub.f32 0.0, %v1019_v24 }
 0x655   :  { %v1562_v27 = vpop.eup %1561  ;;  %v1027_v7 = vadd.f32 1.0, %v1023_v25  ;;  %v1131_v58 = vmul.f32 %v1127_v15, %v1019_v24  ;;  %v1015_v25 = vsel %vm1011_vm4, 1.0, %v1613_v17 }
 0x656   :  { %v1031_v28 = vmul.f32 %v1562_v27, %v1026_v20  ;;  %vm1036_vm10 = vweird.f32 %v1562_v27 }
 0x657   :  { %1563 = vrcp.f32 %v1027_v7  ;;  %vm1037_vm12 = vmor %vm1035_vm11, %vm1036_vm10  ;;  %v1056_v41 = vand.u32 2147483648, %v1027_v7  ;;  %v1054_v43 = vand.u32 2147483647, %v1027_v7  ;;  %vm1050_vm15 = vweird.f32 %v1027_v7 }
 0x658   :  { %v1032_v29 = vsub.f32 1.0, %v1031_v28  ;;  %1565 = vpow2.f32 %v1134_v21  ;;  %v1136_v0 = vmul.f32 1.442695, %v1131_v58  ;;  %v1002_v28 = vmul.f32 0.5, %v2023_v10 }
 0x659   :  { %v1057_v44 = vor.u32 1.1754944e-38, %v1056_v41  ;;  %vm1055_vm2 = vcmp.eq.f32.partialorder %v1054_v43, 8.507059e+37 }
 0x65a   :  { %v1033_v26 = vmul.f32 %v1562_v27, %v1032_v29  ;;  %1567 = vpow2.f32 %v1136_v0 }
 0x65c   :  { %v1034_v31 = vadd.f32 %v1562_v27, %v1033_v26 }
 0x65d   :  { %v1564_v32 = vpop.eup %1563 }
 0x65e   :  { %v1038_v34 = vsel %vm1037_vm12, %v1562_v27, %v1034_v31  ;;  %v1046_v36 = vmul.f32 %v1564_v32, %v1027_v7  ;;  %vm1051_vm14 = vweird.f32 %v1564_v32  ;;  %v1566_v3 = vpop.eup %1565 }
 0x65f   :  { %v1043_v37 = vsel %vm1040_vm13, %v1042_v33, %v1038_v34  ;;  %vm1052_vm1 = vmor %vm1050_vm15, %vm1051_vm14 }
 0x660   :  { %v1047_v39 = vsub.f32 1.0, %v1046_v36  ;;  %v1090_v40 = vmul.f32 1.0614054, %v1043_v37  ;;  %v1568_v16 = vpop.eup %1567 }
 0x662   :  { %v1048_v42 = vmul.f32 %v1564_v32, %v1047_v39  ;;  %v1094_v45 = vadd.f32 -1.4531521, %v1090_v40 }
 0x664   :  { %v1049_v48 = vadd.f32 %v1564_v32, %v1048_v42  ;;  %v1098_v49 = vmul.f32 %v1094_v45, %v1043_v37 }
 0x666   :  { %v1053_v50 = vsel %vm1052_vm1, %v1564_v32, %v1049_v48  ;;  %v1102_v52 = vadd.f32 1.4214138, %v1098_v49 }
 0x667   :  { %v1058_v53 = vsel %vm1055_vm2, %v1057_v44, %v1053_v50 }
 0x668   :  { %v1091_v54 = vmul.f32 1.0614054, %v1058_v53  ;;  %v1106_v55 = vmul.f32 %v1102_v52, %v1043_v37 }
 0x66a   :  { %v1095_v56 = vadd.f32 -1.4531521, %v1091_v54  ;;  %v1110_v57 = vadd.f32 -0.28449672, %v1106_v55 }
 0x66c   :  { %v1099_v59 = vmul.f32 %v1095_v56, %v1058_v53  ;;  %v1114_v60 = vmul.f32 %v1110_v57, %v1043_v37 }
 0x66e   :  { %v1103_v61 = vadd.f32 1.4214138, %v1099_v59  ;;  %v1118_v62 = vadd.f32 0.2548296, %v1114_v60 }
 0x670   :  { %v1107_v1 = vmul.f32 %v1103_v61, %v1058_v53  ;;  %v1122_v2 = vmul.f32 %v1118_v62, %v1043_v37 }
 0x672   :  { %v1111_v5 = vadd.f32 -0.28449672, %v1107_v1  ;;  %v1142_v6 = vmul.f32 %v1566_v3, %v1122_v2 }
 0x674   :  { %v1115_v8 = vmul.f32 %v1111_v5, %v1058_v53  ;;  %v1146_v11 = vsub.f32 1.0, %v1142_v6 }
 0x676   :  { %v1119_v9 = vadd.f32 0.2548296, %v1115_v8  ;;  %v1150_v20 = vmul.f32 %v1146_v11, %v1014_v51 }
 0x678   :  { %v1123_v14 = vmul.f32 %v1119_v9, %v1058_v53  ;;  %v1154_v7 = vadd.f32 1.0, %v1150_v20 }
 0x67a   :  { %v1143_v18 = vmul.f32 %v1568_v16, %v1123_v14  ;;  %v1158_v30 = vmul.f32 %v1154_v7, %v1002_v28 }
 0x67c   :  { %v1147_v24 = vsub.f32 1.0, %v1143_v18 }
 0x67e   :  { %v1151_v27 = vmul.f32 %v1147_v24, %v1015_v25 }
 0x680   :  { %v1155_v29 = vadd.f32 1.0, %v1151_v27 }
 0x682   :  { %v1159_v26 = vmul.f32 %v1155_v29, %v1003_v13 }
 0x684   :  { %v1162_v12 = vpack.c.bf16 %v1159_v26, %v1158_v30 }
 0x686   :  { %1236 = vmatmul.bf16.vlgmr.msrb.gmra.mxu0 %v1162_v12 }
 0x69c   :  { %v931_v31 = vpop.xlane.xlu1 %930 }
 0x69d   :  { %v936_v32 = vmul.f32 %v931_v31, %v1967_v22 }
 0x69f   :  { %v940_v23 = vadd.f32 1e-05, %v936_v32 }
 0x6a1   :  { %1569 = vrsqrt.f32 %v940_v23  ;;  %vm968_vm6 = vweird.f32 %v940_v23 }
 0x6a4   :  { %v933_v33 = vpop.xlane.xlu2 %932 }
 0x6a5   :  { %v937_v34 = vmul.f32 %v933_v33, %v1967_v22 }
 0x6a7   :  { %v1570_v36 = vpop.eup %1569  ;;  %v941_v37 = vadd.f32 1e-05, %v937_v34 }
 0x6a8   :  { %v963_v35 = vmul.f32 %v1570_v36, %v940_v23  ;;  %vm969_vm5 = vweird.f32 %v1570_v36 }
 0x6a9   :  { %1571 = vrsqrt.f32 %v941_v37  ;;  %vm970_vm7 = vmor %vm968_vm6, %vm969_vm5  ;;  %vm978_vm9 = vweird.f32 %v941_v37 }
 0x6aa   :  { %v964_v10 = vmul.f32 %v1570_v36, %v963_v35 }
 0x6ac   :  { %v965_v39 = vmul.f32 0.5, %v964_v10 }
 0x6ae   :  { %v966_v19 = vsub.f32 1.5, %v965_v39 }
 0x6af   :  { %v1572_v40 = vpop.eup %1571 }
 0x6b0   :  { %v967_v41 = vmul.f32 %v1570_v36, %v966_v19  ;;  %v973_v42 = vmul.f32 %v1572_v40, %v941_v37  ;;  %vm979_vm8 = vweird.f32 %v1572_v40 }
 0x6b1   :  { %vm980_vm10 = vmor %vm978_vm9, %vm979_vm8 }
 0x6b2   :  { %v971_v43 = vsel %vm970_vm7, %v1570_v36, %v967_v41  ;;  %v974_v45 = vmul.f32 %v1572_v40, %v973_v42 }
 0x6b3   :  { %v984_v46 = vmul.f32 %v971_v43, %v1976_v38 }
 0x6b4   :  { %v975_v48 = vmul.f32 0.5, %v974_v45 }
 0x6b5   :  { %v992_v22 = vmul.f32 %v2008_v63, %v984_v46 }
 0x6b6   :  { %v976_v49 = vsub.f32 1.5, %v975_v48 }
 0x6b7   :  { %v2049_v44 = vadd.f32 %v2016_v4, %v992_v22 }
 0x6b8   :  { %v977_v50 = vmul.f32 %v1572_v40, %v976_v49 }
 0x6b9   :  { %v2052_v52 = vmul.f32 0.70710677, %v2049_v44 }
 0x6ba   :  { %v981_v53 = vsel %vm980_vm10, %v1572_v40, %v977_v50 }
 0x6bb   :  { %v985_v15 = vmul.f32 %v981_v53, %v1985_v47  ;;  %v1020_v21 = vand.u32 2147483647, %v2052_v52  ;;  %vm1012_vm4 = vcmp.ge.f32.partialorder %v2052_v52, 0.0 }
 0x6bc   :  { %v1016_v49 = vsel %vm1012_vm4, 1.0, %v1613_v17 }
 0x6bd   :  { %v993_v38 = vmul.f32 %v2008_v63, %v985_v15  ;;  %v1024_v54 = vmul.f32 0.3275911, %v1020_v21  ;;  %v1128_v9 = vsub.f32 0.0, %v1020_v21 }
 0x6bf   :  { %v2058_v55 = vadd.f32 %v2016_v4, %v993_v38  ;;  %v1028_v56 = vadd.f32 1.0, %v1024_v54  ;;  %v1132_v24 = vmul.f32 %v1128_v9, %v1020_v21 }
 0x6c1   :  { %v2061_v57 = vmul.f32 0.70710677, %v2058_v55  ;;  %1573 = vrcp.f32 %v1028_v56  ;;  %v1071_v0 = vand.u32 2147483648, %v1028_v56  ;;  %v1069_v63 = vand.u32 2147483647, %v1028_v56 }
 0x6c2   :  { %vm1065_vm12 = vweird.f32 %v1028_v56  ;;  %v1138_v26 = vmul.f32 1.442695, %v1132_v24 }
 0x6c3   :  { %v1021_v58 = vand.u32 2147483647, %v2061_v57  ;;  %v1072_v3 = vor.u32 1.1754944e-38, %v1071_v0  ;;  %vm1070_vm14 = vcmp.eq.f32.partialorder %v1069_v63, 8.507059e+37  ;;  %vm1013_vm5 = vcmp.ge.f32.partialorder %v2061_v57, 0.0 }
 0x6c4   :  { %v1017_v21 = vsel %vm1013_vm5, 1.0, %v1613_v17  ;;  %v1522_v57 = vld [vmem:[%s2113_s21] ss:$0 sm:$0xff] }
 0x6c5   :  { %v1025_v59 = vmul.f32 0.3275911, %v1021_v58  ;;  %v1129_v30 = vsub.f32 0.0, %v1021_v58  ;;  %v1581_v17 = vld [vmem:[%s2133_s2] sm:$0xff] }
 0x6c7   :  { %v1574_v60 = vpop.eup %1573  ;;  %v1029_v61 = vadd.f32 1.0, %v1025_v59  ;;  %v1133_v33 = vmul.f32 %v1129_v30, %v1021_v58  ;;  %v1005_v58 = vmul.f32 0.5, %v2058_v55  ;;  %v1582_v55 = vld [vmem:[%s2133_s2 + $0x8] sm:$0xff] }
 0x6c8   :  { %v1061_v62 = vmul.f32 %v1574_v60, %v1028_v56  ;;  %vm1066_vm11 = vweird.f32 %v1574_v60  ;;  %v1004_v56 = vmul.f32 0.5, %v2049_v44 }
 0x6c9   :  { %1575 = vrcp.f32 %v1029_v61  ;;  %vm1067_vm13 = vmor %vm1065_vm12, %vm1066_vm11  ;;  %v1086_v16 = vand.u32 2147483648, %v1029_v61  ;;  %v1084_v18 = vand.u32 2147483647, %v1029_v61  ;;  %vm1080_vm1 = vweird.f32 %v1029_v61 }
 0x6ca   :  { %v1062_v47 = vsub.f32 1.0, %v1061_v62  ;;  %1577 = vpow2.f32 %v1138_v26  ;;  %v1140_v10 = vmul.f32 1.442695, %v1133_v33 }
 0x6cb   :  { %v1087_v7 = vor.u32 1.1754944e-38, %v1086_v16  ;;  %vm1085_vm3 = vcmp.eq.f32.partialorder %v1084_v18, 8.507059e+37 }
 0x6cc   :  { %v1063_v1 = vmul.f32 %v1574_v60, %v1062_v47  ;;  %1579 = vpow2.f32 %v1140_v10 }
 0x6ce   :  { %v1064_v2 = vadd.f32 %v1574_v60, %v1063_v1 }
 0x6cf   :  { %v1576_v4 = vpop.eup %1575 }
 0x6d0   :  { %v1068_v5 = vsel %vm1067_vm13, %v1574_v60, %v1064_v2  ;;  %v1076_v6 = vmul.f32 %v1576_v4, %v1029_v61  ;;  %vm1081_vm15 = vweird.f32 %v1576_v4  ;;  %v1578_v40 = vpop.eup %1577 }
 0x6d1   :  { %v1073_v8 = vsel %vm1070_vm14, %v1072_v3, %v1068_v5  ;;  %vm1082_vm2 = vmor %vm1080_vm1, %vm1081_vm15 }
 0x6d2   :  { %v1077_v11 = vsub.f32 1.0, %v1076_v6  ;;  %v1092_v14 = vmul.f32 1.0614054, %v1073_v8  ;;  %v1580_v22 = vpop.eup %1579 }
 0x6d4   :  { %v1078_v51 = vmul.f32 %v1576_v4, %v1077_v11  ;;  %v1096_v20 = vadd.f32 -1.4531521, %v1092_v14 }
 0x6d6   :  { %v1079_v25 = vadd.f32 %v1576_v4, %v1078_v51  ;;  %v1100_v27 = vmul.f32 %v1096_v20, %v1073_v8 }
 0x6d8   :  { %v1083_v28 = vsel %vm1082_vm2, %v1576_v4, %v1079_v25  ;;  %v1104_v13 = vadd.f32 1.4214138, %v1100_v27  ;;  %v1583_v4 = vld [vmem:[%s2133_s2 + $0x10] sm:$0xff] }
 0x6d9   :  { %v1088_v29 = vsel %vm1085_vm3, %v1087_v7, %v1083_v28 }
 0x6da   :  { %v1093_v12 = vmul.f32 1.0614054, %v1088_v29  ;;  %v1108_v31 = vmul.f32 %v1104_v13, %v1073_v8 }
 0x6dc   :  { %v1097_v32 = vadd.f32 -1.4531521, %v1093_v12  ;;  %v1112_v23 = vadd.f32 -0.28449672, %v1108_v31 }
 0x6de   :  { %v1101_v34 = vmul.f32 %v1097_v32, %v1088_v29  ;;  %v1116_v36 = vmul.f32 %v1112_v23, %v1073_v8 }
 0x6e0   :  { %v1105_v37 = vadd.f32 1.4214138, %v1101_v34  ;;  %v1120_v35 = vadd.f32 0.2548296, %v1116_v36 }
 0x6e2   :  { %v1109_v39 = vmul.f32 %v1105_v37, %v1088_v29  ;;  %v1124_v19 = vmul.f32 %v1120_v35, %v1073_v8  ;;  %v1584_v8 = vld [vmem:[%s2133_s2 + $0x18] sm:$0xff] }
 0x6e4   :  { %v1113_v41 = vadd.f32 -0.28449672, %v1109_v39  ;;  %v1144_v42 = vmul.f32 %v1578_v40, %v1124_v19 }
 0x6e6   :  { %v1117_v43 = vmul.f32 %v1113_v41, %v1088_v29  ;;  %v1148_v46 = vsub.f32 1.0, %v1144_v42 }
 0x6e8   :  { %v1121_v45 = vadd.f32 0.2548296, %v1117_v43  ;;  %v1152_v53 = vmul.f32 %v1148_v46, %v1016_v49 }
 0x6ea   :  { %v1125_v48 = vmul.f32 %v1121_v45, %v1088_v29  ;;  %v1156_v54 = vadd.f32 1.0, %v1152_v53 }
 0x6ec   :  { %v1145_v50 = vmul.f32 %v1580_v22, %v1125_v48  ;;  %v1160_v59 = vmul.f32 %v1156_v54, %v1004_v56 }
 0x6ee   :  { %v1149_v15 = vsub.f32 1.0, %v1145_v50 }
 0x6f0   :  { %v1153_v38 = vmul.f32 %v1149_v15, %v1017_v21 }
 0x6f2   :  { %v1157_v52 = vadd.f32 1.0, %v1153_v38 }
 0x6f4   :  { %v1161_v60 = vmul.f32 %v1157_v52, %v1005_v58 }
 0x6f6   :  { %v1163_v61 = vpack.c.bf16 %v1161_v60, %v1160_v59 }
 0x6f8   :  { %1241 = vmatmul.bf16.gmra.mxu0 %v1163_v61 }
 0x703   :  { %v1237_v62 = vpop.f32.mrf.mxu0 }
 0x704   :  { %v1247_v47 = vadd.f32 %v1581_v17, %v1237_v62 }
 0x706   :  { %v1255_v0 = vadd.f32 %v1522_v57, %v1247_v47 }
 0x708   :  { %1259 = vst.msk [vmem:[#allocation2] sm:$0xff] %vm123_vm0, %v1255_v0 }
 0x70b   :  { %v1239_v44 = vpop.f32.mrf.mxu0 }
 0x70c   :  { %v1248_v1 = vadd.f32 %v1582_v55, %v1239_v44 }
 0x70e   :  { %v1256_v63 = vadd.f32 %v1522_v57, %v1248_v1 }
 0x710   :  { %1260 = vst.msk [vmem:[#allocation2 + $0x8] sm:$0xff] %vm123_vm0, %v1256_v63 }
 0x775   :  { %v1242_v2 = vpop.f32.mrf.mxu0 }
 0x776   :  { %v1249_v3 = vadd.f32 %v1583_v4, %v1242_v2 }
 0x778   :  { %v1257_v5 = vadd.f32 %v1522_v57, %v1249_v3 }
 0x77a   :  { %1261 = vst.msk [vmem:[#allocation2 + $0x10] sm:$0xff] %vm123_vm0, %v1257_v5 }
 0x77d   :  { %v1244_v6 = vpop.f32.mrf.mxu0 }
 0x77e   :  { %v1250_v9 = vadd.f32 %v1584_v8, %v1244_v6 }
 0x780   :  { %v1258_v11 = vadd.f32 %v1522_v57, %v1250_v9 }
 0x782   :  { %1262 = vst.msk [vmem:[#allocation2 + $0x18] sm:$0xff] %vm123_vm0, %v1258_v11 }
 0x783   :  { %1275 = dma.vmem_to_hbm [thread:$0]  %s1268_s11, 512, %s1270_s23, [#allocation3], %s1615_s5, %s1615_s5, %s1616_s24  }
 0x784   :  { %1609 = dma.done.wait [#allocation3], 512  }
 0x785   :  { %1610 = vsyncadd [#allocation3], 4294966784 }
 0x786   :  { %1280 = vsyncpa [#allocation3], 1 }

</bundles_post_ra>
